<compile_context>
chip_gen: v7x
topology: tpu7x:2x2x1
jax: 0.10.0
libtpu: 0.0.40
codegen_flags: <defaults>
</compile_context>

<pallas_src>
import math
import numpy as np
import jax
import jax.numpy as jnp
from jax import lax
from jax.experimental import pallas as pl
from jax.experimental.pallas import tpu as pltpu

# ----------------------------------------------------------------------------
# Hyperparameters mirroring TransformerNet.__init__
# ----------------------------------------------------------------------------
VOCAB = [chr(ord("a") + i) for i in range(26)] + [" ", "."]  # len(vocabulary) = 28
D_MODEL = len(VOCAB)            # 28 (divisible by nhead=14)
NHEAD = 14
HEAD_DIM = D_MODEL // NHEAD     # 2
NLAYERS = 6
DIM_FF = 2048                   # PyTorch TransformerEncoderLayer default
LN_EPS = 1e-5                   # PyTorch default layer_norm_eps


# ----------------------------------------------------------------------------
# Fused kernel: one grid step == one encoder layer (+ final Linear+ReLU on the last step)
# ----------------------------------------------------------------------------
def fused_layers_kernel(
    x_ref, amask_ref, hm3_ref,
    wqkv_ref, bqkv_ref, wo_ref, bo_ref, g1_ref, be1_ref,
    w1t_ref, b1_ref, w2t_ref, b2_ref, g2_ref, be2_ref,
    wf_ref, bf_ref,
    out_ref,
    xs_ref,
):
    l = pl.program_id(0)

    @pl.when(l == 0)
    def _():
        xs_ref[...] = x_ref[...]

    x = xs_ref[...]                      # (B*S, D) activation carried across layers in VMEM
    hm3 = hm3_ref[...]                   # (H, B*S, D) head-selector mask (precomputed)
    amask = amask_ref[...]               # (H*B*S, B*S) additive mask (causal + cross-batch -1e9)
    H, BS, D = hm3.shape

    def layer_norm(v, g, b):
        mu = jnp.mean(v, axis=-1, keepdims=True)
        var = jnp.mean((v - mu) ** 2, axis=-1, keepdims=True)
        return (v - mu) * lax.rsqrt(var + LN_EPS) * g + b

    # ---- multi-head self-attention: all heads and both batch elements in 3 matmuls ----
    qkv = jnp.dot(x, wqkv_ref[...], preferred_element_type=jnp.float32) + bqkv_ref[...]
    q = qkv[:, :D]                       # (B*S, D); 1/sqrt(head_dim) already folded into Wq/bq
    k = qkv[:, D:2 * D]
    v = qkv[:, 2 * D:]

    # head-masked queries: row (h, b*S+s) holds q[b*S+s] with only head-h lanes kept (exact zeros
    # elsewhere), so contracting over full D gives the per-head score exactly.
    qh = (q[None, :, :] * hm3).reshape(H * BS, D)                       # (H*B*S, D)
    s = lax.dot_general(qh, k, (((1,), (1,)), ((), ())),
                        preferred_element_type=jnp.float32) + amask    # (H*B*S, B*S)

    m = jnp.max(s, axis=-1, keepdims=True)
    p = jnp.exp(s - m)
    attn = p * pl.reciprocal(jnp.sum(p, axis=-1, keepdims=True), approx=True)

    ctxh = jnp.dot(attn, v, preferred_element_type=jnp.float32)        # (H*B*S, D)
    # head-select + implicit head-concat (lanes are head-aligned): sum over heads
    ctx = jnp.sum(ctxh.reshape(H, BS, D) * hm3, axis=0)                # (B*S, D)

    attn_out = jnp.dot(ctx, wo_ref[...], preferred_element_type=jnp.float32) + bo_ref[...]

    # ---- residual + LayerNorm 1 (post-norm) ----
    y = layer_norm(x + attn_out, g1_ref[...], be1_ref[...])

    # ---- feed-forward: bf16 weights & operands, f32 accumulation ----
    h1 = jnp.dot(y.astype(jnp.bfloat16), w1t_ref[...],
                 preferred_element_type=jnp.float32) + b1_ref[...]     # (B*S, FF)
    h1 = jnp.maximum(h1, 0.0)
    ff = jnp.dot(h1.astype(jnp.bfloat16), w2t_ref[...],
                 preferred_element_type=jnp.float32) + b2_ref[...]     # (B*S, D)

    # ---- residual + LayerNorm 2 ----
    x_new = layer_norm(y + ff, g2_ref[...], be2_ref[...])
    xs_ref[...] = x_new

    # ---- final Linear + ReLU, only on the last layer ----
    @pl.when(l == pl.num_programs(0) - 1)
    def _():
        out = jnp.dot(x_new, wf_ref[...], preferred_element_type=jnp.float32) + bf_ref[...]
        out_ref[...] = jnp.maximum(out, 0.0).astype(out_ref.dtype)


def fused_forward_pallas(x2d, amask, hm3, P):
    BS, D = x2d.shape
    H = hm3.shape[0]
    FF = DIM_FF

    per_layer = lambda d1, d2: pl.BlockSpec((None, d1, d2), lambda l: (l, 0, 0))
    const2 = lambda d1, d2: pl.BlockSpec((d1, d2), lambda l: (0, 0))
    const3 = lambda d1, d2, d3: pl.BlockSpec((d1, d2, d3), lambda l: (0, 0, 0))

    grid_spec = pltpu.PrefetchScalarGridSpec(
        num_scalar_prefetch=0,
        grid=(NLAYERS,),
        in_specs=[
            const2(BS, D),            # x
            const2(H * BS, BS),       # additive attention mask (heads x batch flattened)
            const3(H, BS, D),         # head-selector mask
            per_layer(D, 3 * D),      # [Wq^T*scale | Wk^T | Wv^T]
            per_layer(1, 3 * D),      # qkv bias
            per_layer(D, D),          # Wo^T
            per_layer(1, D),          # bo
            per_layer(1, D),          # ln1 gamma
            per_layer(1, D),          # ln1 beta
            per_layer(D, FF),         # W1^T (bf16)
            per_layer(1, FF),         # b1
            per_layer(FF, D),         # W2^T (bf16)
            per_layer(1, D),          # b2
            per_layer(1, D),          # ln2 gamma
            per_layer(1, D),          # ln2 beta
            const2(D, D),             # final W^T
            const2(1, D),             # final b
        ],
        out_specs=pl.BlockSpec((BS, D), lambda l: (0, 0)),
        scratch_shapes=[pltpu.VMEM((BS, D), jnp.float32)],
    )
    return pl.pallas_call(
        fused_layers_kernel,
        grid_spec=grid_spec,
        out_shape=jax.ShapeDtypeStruct((BS, D), jnp.float32),
        compiler_params=pltpu.CompilerParams(dimension_semantics=("arbitrary",)),
    )(x2d, amask, hm3,
      P["wqkv"], P["bqkv"], P["wo_t"], P["bo"], P["g1"], P["be1"],
      P["w1t"], P["b1"], P["w2t"], P["b2"], P["g2"], P["be2"],
      P["wf_t"], P["bf"])


# ----------------------------------------------------------------------------
# Deterministic parameter init (shapes follow nn.TransformerEncoderLayer / nn.Linear)
# ----------------------------------------------------------------------------
def init_params(key):
    def w(k, shape, scale=0.02):
        return (scale * jax.random.normal(k, shape)).astype(jnp.float32)

    layers = []
    for _ in range(NLAYERS):
        key, *ks = jax.random.split(key, 12)
        layers.append(dict(
            Wq=w(ks[0], (D_MODEL, D_MODEL)), bq=w(ks[1], (D_MODEL,)),
            Wk=w(ks[2], (D_MODEL, D_MODEL)), bk=w(ks[3], (D_MODEL,)),
            Wv=w(ks[4], (D_MODEL, D_MODEL)), bv=w(ks[5], (D_MODEL,)),
            Wo=w(ks[6], (D_MODEL, D_MODEL)), bo=jnp.zeros((D_MODEL,), jnp.float32),
            g1=jnp.ones((D_MODEL,), jnp.float32), be1=jnp.zeros((D_MODEL,), jnp.float32),
            W1=w(ks[7], (DIM_FF, D_MODEL)), b1=w(ks[8], (DIM_FF,)),
            W2=w(ks[9], (D_MODEL, DIM_FF)), b2=w(ks[10], (D_MODEL,)),
            g2=jnp.ones((D_MODEL,), jnp.float32), be2=jnp.zeros((D_MODEL,), jnp.float32),
        ))
    key, k1, k2 = jax.random.split(key, 3)
    final = dict(W=w(k1, (D_MODEL, D_MODEL)), b=w(k2, (D_MODEL,)))
    return layers, final


def pack_params(layers, final):
    """One-time packing into the layouts the fused kernel consumes (hoisted out of forward)."""
    scale = 1.0 / math.sqrt(HEAD_DIM)
    wqkv = jnp.stack([jnp.concatenate([(p["Wq"] * scale).T, p["Wk"].T, p["Wv"].T], axis=1)
                      for p in layers])                                       # (L, D, 3D)
    bqkv = jnp.stack([jnp.concatenate([p["bq"] * scale, p["bk"], p["bv"]])[None, :]
                      for p in layers])                                       # (L, 1, 3D)
    wo_t = jnp.stack([p["Wo"].T for p in layers])                             # (L, D, D)
    bo = jnp.stack([p["bo"][None, :] for p in layers])                        # (L, 1, D)
    g1 = jnp.stack([p["g1"][None, :] for p in layers])
    be1 = jnp.stack([p["be1"][None, :] for p in layers])
    w1t = jnp.stack([p["W1"].T for p in layers]).astype(jnp.bfloat16)         # (L, D, FF) bf16
    b1 = jnp.stack([p["b1"][None, :] for p in layers])                        # (L, 1, FF)
    w2t = jnp.stack([p["W2"].T for p in layers]).astype(jnp.bfloat16)         # (L, FF, D) bf16
    b2 = jnp.stack([p["b2"][None, :] for p in layers])
    g2 = jnp.stack([p["g2"][None, :] for p in layers])
    be2 = jnp.stack([p["be2"][None, :] for p in layers])
    return dict(wqkv=wqkv, bqkv=bqkv, wo_t=wo_t, bo=bo, g1=g1, be1=be1,
                w1t=w1t, b1=b1, w2t=w2t, b2=b2, g2=g2, be2=be2,
                wf_t=final["W"].T, bf=final["b"][None, :])


@jax.jit
def transformer_net_forward(src_sbd, src_mask, packed):
    S, B, D = src_sbd.shape
    BS = B * S
    x2d = jnp.transpose(src_sbd, (1, 0, 2)).reshape(BS, D)            # (S,B,D) -> (B*S, D)

    # head-selector mask broadcast over all rows: hm3[h, i, d] = 1 iff lane d belongs to head h
    hm = (jnp.arange(D)[None, :] // HEAD_DIM
          == jnp.arange(NHEAD)[:, None]).astype(jnp.float32)          # (H, D)
    hm3 = jnp.broadcast_to(hm[:, None, :], (NHEAD, BS, D))            # (H, B*S, D)

    # additive mask: causal within the same batch element, -1e9 across batch; tiled over heads
    same_batch = jnp.eye(B, dtype=bool)[:, None, :, None]             # (B,1,B,1)
    inner = jnp.where(same_batch, src_mask[None, :, None, :], -1e9)   # (B,S,B,S)
    amask = jnp.tile(inner.reshape(BS, BS).astype(jnp.float32), (NHEAD, 1))  # (H*B*S, B*S)

    out2d = fused_forward_pallas(x2d, amask, hm3, packed)             # (B*S, D)
    # back to PyTorch ordering: (S,B,D).reshape(-1, D)
    return out2d.reshape(B, S, D).transpose(1, 0, 2).reshape(S * B, D)


# ----------------------------------------------------------------------------
# Pure-JAX reference (mirrors PyTorch post-norm TransformerEncoderLayer, eval mode)
# ----------------------------------------------------------------------------
def _ref_ln(v, g, b):
    mu = jnp.mean(v, -1, keepdims=True)
    var = jnp.mean((v - mu) ** 2, -1, keepdims=True)
    return (v - mu) / jnp.sqrt(var + LN_EPS) * g + b


def ref_encoder_layer(x, mask, p):  # x: (B, S, D)
    B, S, D = x.shape
    q = x @ p["Wq"].T + p["bq"]
    k = x @ p["Wk"].T + p["bk"]
    v = x @ p["Wv"].T + p["bv"]
    qh = q.reshape(B, S, NHEAD, HEAD_DIM).transpose(0, 2, 1, 3)
    kh = k.reshape(B, S, NHEAD, HEAD_DIM).transpose(0, 2, 1, 3)
    vh = v.reshape(B, S, NHEAD, HEAD_DIM).transpose(0, 2, 1, 3)
    scores = jnp.einsum("bhqe,bhke->bhqk", qh, kh) / math.sqrt(HEAD_DIM) + mask
    attn = jax.nn.softmax(scores, axis=-1)
    ctx = jnp.einsum("bhqk,bhke->bhqe", attn, vh)
    ctx = ctx.transpose(0, 2, 1, 3).reshape(B, S, D)
    a = ctx @ p["Wo"].T + p["bo"]
    y = _ref_ln(x + a, p["g1"], p["be1"])
    ff = jnp.maximum(y @ p["W1"].T + p["b1"], 0.0) @ p["W2"].T + p["b2"]
    return _ref_ln(y + ff, p["g2"], p["be2"])


def ref_forward(src_sbd, mask, layers, final):
    x = jnp.transpose(src_sbd, (1, 0, 2))
    for p in layers:
        x = ref_encoder_layer(x, mask, p)
    x = jnp.maximum(x @ final["W"].T + final["b"], 0.0)
    return jnp.transpose(x, (1, 0, 2)).reshape(-1, D_MODEL)


# ----------------------------------------------------------------------------
if __name__ == "__main__":
    key = jax.random.PRNGKey(0)
    key, kx, kp = jax.random.split(key, 3)

    S, B = 8, 2
    # PyTorch layout: src is (seq, batch, d_model), src_mask is (seq, seq) additive.
    src = jax.random.normal(kx, (S, B, D_MODEL), dtype=jnp.float32)
    src_mask = jnp.where(jnp.tril(jnp.ones((S, S), dtype=bool)),
                         0.0, -1e9).astype(jnp.float32)

    layers, final = init_params(kp)
    packed = pack_params(layers, final)          # one-time weight packing

    out = transformer_net_forward(src, src_mask, packed)
    out = jax.block_until_ready(out)

    ref = jax.block_until_ready(ref_forward(src, src_mask, layers, final))
    assert out.shape == (S * B, D_MODEL)
    np.testing.assert_allclose(np.asarray(out), np.asarray(ref), rtol=2e-2, atol=5e-3)

    print("KERNEL_OK")
</pallas_src>

<mosaic_0001>
module attributes {stable_mosaic.version = 11 : i64} {
  func.func @fused_layers_kernel(%arg0: i32, %arg1: memref<16x28xf32, #tpu.memory_space<vmem>>, %arg2: memref<224x16xf32, #tpu.memory_space<vmem>>, %arg3: memref<14x16x28xf32, #tpu.memory_space<vmem>>, %arg4: memref<1x28x84xf32, #tpu.memory_space<vmem>>, %arg5: memref<1x1x84xf32, #tpu.memory_space<vmem>>, %arg6: memref<1x28x28xf32, #tpu.memory_space<vmem>>, %arg7: memref<1x1x28xf32, #tpu.memory_space<vmem>>, %arg8: memref<1x1x28xf32, #tpu.memory_space<vmem>>, %arg9: memref<1x1x28xf32, #tpu.memory_space<vmem>>, %arg10: memref<1x28x2048xbf16, #tpu.memory_space<vmem>>, %arg11: memref<1x1x2048xf32, #tpu.memory_space<vmem>>, %arg12: memref<1x2048x28xbf16, #tpu.memory_space<vmem>>, %arg13: memref<1x1x28xf32, #tpu.memory_space<vmem>>, %arg14: memref<1x1x28xf32, #tpu.memory_space<vmem>>, %arg15: memref<1x1x28xf32, #tpu.memory_space<vmem>>, %arg16: memref<28x28xf32, #tpu.memory_space<vmem>>, %arg17: memref<1x28xf32, #tpu.memory_space<vmem>>, %arg18: memref<16x28xf32, #tpu.memory_space<vmem>>, %arg19: memref<16x28xf32, #tpu.memory_space<vmem>>) attributes {dimension_semantics = [#tpu.dimension_semantics<arbitrary>], iteration_bounds = array<i64: 6>, scalar_prefetch = 0 : i64, scratch_operands = 1 : i64, tpu.core_type = #tpu.core_type<tc>, window_params = [{pipeline_mode = #tpu.pipeline_mode<synchronous>, transform_indices = @transform_0, window_bounds = array<i64: 16, 28>}, {pipeline_mode = #tpu.pipeline_mode<synchronous>, transform_indices = @transform_1, window_bounds = array<i64: 224, 16>}, {pipeline_mode = #tpu.pipeline_mode<synchronous>, transform_indices = @transform_2, window_bounds = array<i64: 14, 16, 28>}, {transform_indices = @transform_3, window_bounds = array<i64: 1, 28, 84>}, {transform_indices = @transform_4, window_bounds = array<i64: 1, 1, 84>}, {transform_indices = @transform_5, window_bounds = array<i64: 1, 28, 28>}, {transform_indices = @transform_6, window_bounds = array<i64: 1, 1, 28>}, {transform_indices = @transform_7, window_bounds = array<i64: 1, 1, 28>}, {transform_indices = @transform_8, window_bounds = array<i64: 1, 1, 28>}, {transform_indices = @transform_9, window_bounds = array<i64: 1, 28, 2048>}, {transform_indices = @transform_10, window_bounds = array<i64: 1, 1, 2048>}, {transform_indices = @transform_11, window_bounds = array<i64: 1, 2048, 28>}, {transform_indices = @transform_12, window_bounds = array<i64: 1, 1, 28>}, {transform_indices = @transform_13, window_bounds = array<i64: 1, 1, 28>}, {transform_indices = @transform_14, window_bounds = array<i64: 1, 1, 28>}, {pipeline_mode = #tpu.pipeline_mode<synchronous>, transform_indices = @transform_15, window_bounds = array<i64: 28, 28>}, {pipeline_mode = #tpu.pipeline_mode<synchronous>, transform_indices = @transform_16, window_bounds = array<i64: 1, 28>}, {pipeline_mode = #tpu.pipeline_mode<synchronous>, transform_indices = @transform_17, window_bounds = array<i64: 16, 28>}]} {
    %c0_i32 = arith.constant 0 : i32
    %0 = arith.cmpi eq, %arg0, %c0_i32 : i32
    %1 = arith.extui %0 : i1 to i32
    %c0_i32_0 = arith.constant 0 : i32
    %2 = arith.cmpi ne, %1, %c0_i32_0 : i32
    scf.if %2 {
      %c0_65 = arith.constant 0 : index
      %c0_66 = arith.constant 0 : index
      %119 = vector.load %arg1[%c0_65, %c0_66] : memref<16x28xf32, #tpu.memory_space<vmem>>, vector<16x28xf32>
      %c0_67 = arith.constant 0 : index
      %c0_68 = arith.constant 0 : index
      %120 = vector.load %arg19[%c0_67, %c0_68] : memref<16x28xf32, #tpu.memory_space<vmem>>, vector<16x28xf32>
      tpu.vector_store %arg19[%c0_67, %c0_68], %119 {strides = array<i32>} : memref<16x28xf32, #tpu.memory_space<vmem>>, vector<16x28xf32>,
    } else {
    }
    %c0 = arith.constant 0 : index
    %c0_1 = arith.constant 0 : index
    %3 = vector.load %arg19[%c0, %c0_1] : memref<16x28xf32, #tpu.memory_space<vmem>>, vector<16x28xf32>
    %c0_2 = arith.constant 0 : index
    %c0_3 = arith.constant 0 : index
    %c0_4 = arith.constant 0 : index
    %4 = vector.load %arg3[%c0_2, %c0_3, %c0_4] : memref<14x16x28xf32, #tpu.memory_space<vmem>>, vector<14x16x28xf32>
    %c0_5 = arith.constant 0 : index
    %c0_6 = arith.constant 0 : index
    %5 = vector.load %arg2[%c0_5, %c0_6] : memref<224x16xf32, #tpu.memory_space<vmem>>, vector<224x16xf32>
    %c0_7 = arith.constant 0 : index
    %c0_8 = arith.constant 0 : index
    %c0_9 = arith.constant 0 : index
    %6 = vector.load %arg4[%c0_7, %c0_8, %c0_9] : memref<1x28x84xf32, #tpu.memory_space<vmem>>, vector<1x28x84xf32>
    %7 = vector.shape_cast %6 : vector<1x28x84xf32> to vector<28x84xf32>
    %cst = arith.constant dense<0.000000e+00> : vector<16x84xf32>
    %8 = tpu.matmul %3, %7, %cst {dimension_numbers = #tpu.dot_dimension_numbers<[1], [0], [0], [1], [0, 0, 1, 1], [], []>} : vector<16x28xf32>, vector<28x84xf32>, vector<16x84xf32> -> vector<16x84xf32>
    %c0_10 = arith.constant 0 : index
    %c0_11 = arith.constant 0 : index
    %c0_12 = arith.constant 0 : index
    %9 = vector.load %arg5[%c0_10, %c0_11, %c0_12] : memref<1x1x84xf32, #tpu.memory_space<vmem>>, vector<1x1x84xf32>
    %10 = vector.shape_cast %9 : vector<1x1x84xf32> to vector<1x84xf32>
    %11 = vector.broadcast %10 : vector<1x84xf32> to vector<16x84xf32>
    %12 = arith.addf %8, %11 : vector<16x84xf32>
    %13 = vector.extract_strided_slice %12 {offsets = [0, 0], sizes = [16, 28], strides = [1, 1]} : vector<16x84xf32> to vector<16x28xf32>
    %14 = vector.extract_strided_slice %12 {offsets = [0, 28], sizes = [16, 28], strides = [1, 1]} : vector<16x84xf32> to vector<16x28xf32>
    %15 = vector.extract_strided_slice %12 {offsets = [0, 56], sizes = [16, 28], strides = [1, 1]} : vector<16x84xf32> to vector<16x28xf32>
    %16 = vector.shape_cast %13 : vector<16x28xf32> to vector<1x16x28xf32>
    %17 = vector.broadcast %16 : vector<1x16x28xf32> to vector<14x16x28xf32>
    %18 = arith.mulf %17, %4 : vector<14x16x28xf32>
    %19 = vector.shape_cast %18 : vector<14x16x28xf32> to vector<224x28xf32>
    %cst_13 = arith.constant dense<0.000000e+00> : vector<224x16xf32>
    %20 = tpu.matmul %19, %14, %cst_13 {dimension_numbers = #tpu.dot_dimension_numbers<[1], [1], [0], [0], [0, 0, 1, 0], [], []>} : vector<224x28xf32>, vector<16x28xf32>, vector<224x16xf32> -> vector<224x16xf32>
    %21 = arith.addf %20, %5 : vector<224x16xf32>
    %cst_14 = arith.constant dense<0xFF800000> : vector<224xf32>
    %22 = vector.multi_reduction <maximumf>, %21, %cst_14 [1] : vector<224x16xf32> to vector<224xf32>
    %23 = vector.shape_cast %22 : vector<224xf32> to vector<224x1xf32>
    %24 = vector.broadcast %23 : vector<224x1xf32> to vector<224x16xf32>
    %25 = arith.subf %21, %24 : vector<224x16xf32>
    %26 = math.exp %25 : vector<224x16xf32>
    %cst_15 = arith.constant dense<0.000000e+00> : vector<224xf32>
    %27 = vector.multi_reduction <add>, %26, %cst_15 [1] : vector<224x16xf32> to vector<224xf32>
    %28 = vector.shape_cast %27 : vector<224xf32> to vector<224x1xf32>
    %29 = tpu.reciprocal %28 {approx = true} : vector<224x1xf32> -> vector<224x1xf32>
    %30 = vector.broadcast %29 : vector<224x1xf32> to vector<224x16xf32>
    %31 = arith.mulf %26, %30 : vector<224x16xf32>
    %cst_16 = arith.constant dense<0.000000e+00> : vector<224x28xf32>
    %32 = tpu.matmul %31, %15, %cst_16 {dimension_numbers = #tpu.dot_dimension_numbers<[1], [0], [0], [1], [0, 0, 1, 1], [], []>} : vector<224x16xf32>, vector<16x28xf32>, vector<224x28xf32> -> vector<224x28xf32>
    %33 = vector.shape_cast %32 : vector<224x28xf32> to vector<14x16x28xf32>
    %34 = arith.mulf %33, %4 : vector<14x16x28xf32>
    %cst_17 = arith.constant dense<0.000000e+00> : vector<16x28xf32>
    %35 = vector.multi_reduction <add>, %34, %cst_17 [0] : vector<14x16x28xf32> to vector<16x28xf32>
    %c0_18 = arith.constant 0 : index
    %c0_19 = arith.constant 0 : index
    %c0_20 = arith.constant 0 : index
    %36 = vector.load %arg6[%c0_18, %c0_19, %c0_20] : memref<1x28x28xf32, #tpu.memory_space<vmem>>, vector<1x28x28xf32>
    %37 = vector.shape_cast %36 : vector<1x28x28xf32> to vector<28x28xf32>
    %cst_21 = arith.constant dense<0.000000e+00> : vector<16x28xf32>
    %38 = tpu.matmul %35, %37, %cst_21 {dimension_numbers = #tpu.dot_dimension_numbers<[1], [0], [0], [1], [0, 0, 1, 1], [], []>} : vector<16x28xf32>, vector<28x28xf32>, vector<16x28xf32> -> vector<16x28xf32>
    %c0_22 = arith.constant 0 : index
    %c0_23 = arith.constant 0 : index
    %c0_24 = arith.constant 0 : index
    %39 = vector.load %arg7[%c0_22, %c0_23, %c0_24] : memref<1x1x28xf32, #tpu.memory_space<vmem>>, vector<1x1x28xf32>
    %40 = vector.shape_cast %39 : vector<1x1x28xf32> to vector<1x28xf32>
    %41 = vector.broadcast %40 : vector<1x28xf32> to vector<16x28xf32>
    %42 = arith.addf %38, %41 : vector<16x28xf32>
    %43 = arith.addf %3, %42 : vector<16x28xf32>
    %c0_25 = arith.constant 0 : index
    %c0_26 = arith.constant 0 : index
    %c0_27 = arith.constant 0 : index
    %44 = vector.load %arg8[%c0_25, %c0_26, %c0_27] : memref<1x1x28xf32, #tpu.memory_space<vmem>>, vector<1x1x28xf32>
    %45 = vector.shape_cast %44 : vector<1x1x28xf32> to vector<1x28xf32>
    %c0_28 = arith.constant 0 : index
    %c0_29 = arith.constant 0 : index
    %c0_30 = arith.constant 0 : index
    %46 = vector.load %arg9[%c0_28, %c0_29, %c0_30] : memref<1x1x28xf32, #tpu.memory_space<vmem>>, vector<1x1x28xf32>
    %47 = vector.shape_cast %46 : vector<1x1x28xf32> to vector<1x28xf32>
    %cst_31 = arith.constant dense<0.000000e+00> : vector<16xf32>
    %48 = vector.multi_reduction <add>, %43, %cst_31 [1] : vector<16x28xf32> to vector<16xf32>
    %49 = vector.shape_cast %48 : vector<16xf32> to vector<16x1xf32>
    %cst_32 = arith.constant 2.800000e+01 : f32
    %50 = vector.broadcast %cst_32 : f32 to vector<16x1xf32>
    %51 = arith.divf %49, %50 : vector<16x1xf32>
    %52 = vector.broadcast %51 : vector<16x1xf32> to vector<16x28xf32>
    %53 = arith.subf %43, %52 : vector<16x28xf32>
    %54 = arith.mulf %53, %53 : vector<16x28xf32>
    %cst_33 = arith.constant dense<0.000000e+00> : vector<16xf32>
    %55 = vector.multi_reduction <add>, %54, %cst_33 [1] : vector<16x28xf32> to vector<16xf32>
    %56 = vector.shape_cast %55 : vector<16xf32> to vector<16x1xf32>
    %cst_34 = arith.constant 2.800000e+01 : f32
    %57 = vector.broadcast %cst_34 : f32 to vector<16x1xf32>
    %58 = arith.divf %56, %57 : vector<16x1xf32>
    %59 = vector.broadcast %51 : vector<16x1xf32> to vector<16x28xf32>
    %60 = arith.subf %43, %59 : vector<16x28xf32>
    %cst_35 = arith.constant 9.99999974E-6 : f32
    %61 = vector.broadcast %cst_35 : f32 to vector<16x1xf32>
    %62 = arith.addf %58, %61 : vector<16x1xf32>
    %63 = math.rsqrt %62 : vector<16x1xf32>
    %64 = vector.broadcast %63 : vector<16x1xf32> to vector<16x28xf32>
    %65 = arith.mulf %60, %64 : vector<16x28xf32>
    %66 = vector.broadcast %45 : vector<1x28xf32> to vector<16x28xf32>
    %67 = arith.mulf %65, %66 : vector<16x28xf32>
    %68 = vector.broadcast %47 : vector<1x28xf32> to vector<16x28xf32>
    %69 = arith.addf %67, %68 : vector<16x28xf32>
    %70 = arith.truncf %69 : vector<16x28xf32> to vector<16x28xbf16>
    %c0_36 = arith.constant 0 : index
    %c0_37 = arith.constant 0 : index
    %c0_38 = arith.constant 0 : index
    %71 = vector.load %arg10[%c0_36, %c0_37, %c0_38] : memref<1x28x2048xbf16, #tpu.memory_space<vmem>>, vector<1x28x2048xbf16>
    %72 = vector.shape_cast %71 : vector<1x28x2048xbf16> to vector<28x2048xbf16>
    %cst_39 = arith.constant dense<0.000000e+00> : vector<16x2048xf32>
    %73 = tpu.matmul %70, %72, %cst_39 {dimension_numbers = #tpu.dot_dimension_numbers<[1], [0], [0], [1], [0, 0, 1, 1], [], []>} : vector<16x28xbf16>, vector<28x2048xbf16>, vector<16x2048xf32> -> vector<16x2048xf32>
    %c0_40 = arith.constant 0 : index
    %c0_41 = arith.constant 0 : index
    %c0_42 = arith.constant 0 : index
    %74 = vector.load %arg11[%c0_40, %c0_41, %c0_42] : memref<1x1x2048xf32, #tpu.memory_space<vmem>>, vector<1x1x2048xf32>
    %75 = vector.shape_cast %74 : vector<1x1x2048xf32> to vector<1x2048xf32>
    %76 = vector.broadcast %75 : vector<1x2048xf32> to vector<16x2048xf32>
    %77 = arith.addf %73, %76 : vector<16x2048xf32>
    %cst_43 = arith.constant 0.000000e+00 : f32
    %78 = vector.broadcast %cst_43 : f32 to vector<16x2048xf32>
    %79 = arith.maximumf %77, %78 : vector<16x2048xf32>
    %80 = arith.truncf %79 : vector<16x2048xf32> to vector<16x2048xbf16>
    %c0_44 = arith.constant 0 : index
    %c0_45 = arith.constant 0 : index
    %c0_46 = arith.constant 0 : index
    %81 = vector.load %arg12[%c0_44, %c0_45, %c0_46] : memref<1x2048x28xbf16, #tpu.memory_space<vmem>>, vector<1x2048x28xbf16>
    %82 = vector.shape_cast %81 : vector<1x2048x28xbf16> to vector<2048x28xbf16>
    %cst_47 = arith.constant dense<0.000000e+00> : vector<16x28xf32>
    %83 = tpu.matmul %80, %82, %cst_47 {dimension_numbers = #tpu.dot_dimension_numbers<[1], [0], [0], [1], [0, 0, 1, 1], [], []>} : vector<16x2048xbf16>, vector<2048x28xbf16>, vector<16x28xf32> -> vector<16x28xf32>
    %c0_48 = arith.constant 0 : index
    %c0_49 = arith.constant 0 : index
    %c0_50 = arith.constant 0 : index
    %84 = vector.load %arg13[%c0_48, %c0_49, %c0_50] : memref<1x1x28xf32, #tpu.memory_space<vmem>>, vector<1x1x28xf32>
    %85 = vector.shape_cast %84 : vector<1x1x28xf32> to vector<1x28xf32>
    %86 = vector.broadcast %85 : vector<1x28xf32> to vector<16x28xf32>
    %87 = arith.addf %83, %86 : vector<16x28xf32>
    %88 = arith.addf %69, %87 : vector<16x28xf32>
    %c0_51 = arith.constant 0 : index
    %c0_52 = arith.constant 0 : index
    %c0_53 = arith.constant 0 : index
    %89 = vector.load %arg14[%c0_51, %c0_52, %c0_53] : memref<1x1x28xf32, #tpu.memory_space<vmem>>, vector<1x1x28xf32>
    %90 = vector.shape_cast %89 : vector<1x1x28xf32> to vector<1x28xf32>
    %c0_54 = arith.constant 0 : index
    %c0_55 = arith.constant 0 : index
    %c0_56 = arith.constant 0 : index
    %91 = vector.load %arg15[%c0_54, %c0_55, %c0_56] : memref<1x1x28xf32, #tpu.memory_space<vmem>>, vector<1x1x28xf32>
    %92 = vector.shape_cast %91 : vector<1x1x28xf32> to vector<1x28xf32>
    %cst_57 = arith.constant dense<0.000000e+00> : vector<16xf32>
    %93 = vector.multi_reduction <add>, %88, %cst_57 [1] : vector<16x28xf32> to vector<16xf32>
    %94 = vector.shape_cast %93 : vector<16xf32> to vector<16x1xf32>
    %cst_58 = arith.constant 2.800000e+01 : f32
    %95 = vector.broadcast %cst_58 : f32 to vector<16x1xf32>
    %96 = arith.divf %94, %95 : vector<16x1xf32>
    %97 = vector.broadcast %96 : vector<16x1xf32> to vector<16x28xf32>
    %98 = arith.subf %88, %97 : vector<16x28xf32>
    %99 = arith.mulf %98, %98 : vector<16x28xf32>
    %cst_59 = arith.constant dense<0.000000e+00> : vector<16xf32>
    %100 = vector.multi_reduction <add>, %99, %cst_59 [1] : vector<16x28xf32> to vector<16xf32>
    %101 = vector.shape_cast %100 : vector<16xf32> to vector<16x1xf32>
    %cst_60 = arith.constant 2.800000e+01 : f32
    %102 = vector.broadcast %cst_60 : f32 to vector<16x1xf32>
    %103 = arith.divf %101, %102 : vector<16x1xf32>
    %104 = vector.broadcast %96 : vector<16x1xf32> to vector<16x28xf32>
    %105 = arith.subf %88, %104 : vector<16x28xf32>
    %cst_61 = arith.constant 9.99999974E-6 : f32
    %106 = vector.broadcast %cst_61 : f32 to vector<16x1xf32>
    %107 = arith.addf %103, %106 : vector<16x1xf32>
    %108 = math.rsqrt %107 : vector<16x1xf32>
    %109 = vector.broadcast %108 : vector<16x1xf32> to vector<16x28xf32>
    %110 = arith.mulf %105, %109 : vector<16x28xf32>
    %111 = vector.broadcast %90 : vector<1x28xf32> to vector<16x28xf32>
    %112 = arith.mulf %110, %111 : vector<16x28xf32>
    %113 = vector.broadcast %92 : vector<1x28xf32> to vector<16x28xf32>
    %114 = arith.addf %112, %113 : vector<16x28xf32>
    %c0_62 = arith.constant 0 : index
    %c0_63 = arith.constant 0 : index
    %115 = vector.load %arg19[%c0_62, %c0_63] : memref<16x28xf32, #tpu.memory_space<vmem>>, vector<16x28xf32>
    tpu.vector_store %arg19[%c0_62, %c0_63], %114 {strides = array<i32>} : memref<16x28xf32, #tpu.memory_space<vmem>>, vector<16x28xf32>,
    %c5_i32 = arith.constant 5 : i32
    %116 = arith.cmpi eq, %arg0, %c5_i32 : i32
    %117 = arith.extui %116 : i1 to i32
    %c0_i32_64 = arith.constant 0 : i32
    %118 = arith.cmpi ne, %117, %c0_i32_64 : i32
    scf.if %118 {
      %c0_65 = arith.constant 0 : index
      %c0_66 = arith.constant 0 : index
      %119 = vector.load %arg16[%c0_65, %c0_66] : memref<28x28xf32, #tpu.memory_space<vmem>>, vector<28x28xf32>
      %cst_67 = arith.constant dense<0.000000e+00> : vector<16x28xf32>
      %120 = tpu.matmul %114, %119, %cst_67 {dimension_numbers = #tpu.dot_dimension_numbers<[1], [0], [0], [1], [0, 0, 1, 1], [], []>} : vector<16x28xf32>, vector<28x28xf32>, vector<16x28xf32> -> vector<16x28xf32>
      %c0_68 = arith.constant 0 : index
      %c0_69 = arith.constant 0 : index
      %121 = vector.load %arg17[%c0_68, %c0_69] : memref<1x28xf32, #tpu.memory_space<vmem>>, vector<1x28xf32>
      %122 = vector.broadcast %121 : vector<1x28xf32> to vector<16x28xf32>
      %123 = arith.addf %120, %122 : vector<16x28xf32>
      %cst_70 = arith.constant 0.000000e+00 : f32
      %124 = vector.broadcast %cst_70 : f32 to vector<16x28xf32>
      %125 = arith.maximumf %123, %124 : vector<16x28xf32>
      %c0_71 = arith.constant 0 : index
      %c0_72 = arith.constant 0 : index
      %126 = vector.load %arg18[%c0_71, %c0_72] : memref<16x28xf32, #tpu.memory_space<vmem>>, vector<16x28xf32>
      tpu.vector_store %arg18[%c0_71, %c0_72], %125 {strides = array<i32>} : memref<16x28xf32, #tpu.memory_space<vmem>>, vector<16x28xf32>,
    } else {
    }
    return
  }
  func.func @transform_0(%arg0: i32) -> (i32, i32) {
    %c0_i32 = arith.constant 0 : i32
    %c0_i32_0 = arith.constant 0 : i32
    %c0_i32_1 = arith.constant 0 : i32
    return %c0_i32, %c0_i32_0 : i32, i32
  }
  func.func @transform_1(%arg0: i32) -> (i32, i32) {
    %c0_i32 = arith.constant 0 : i32
    %c0_i32_0 = arith.constant 0 : i32
    %c0_i32_1 = arith.constant 0 : i32
    return %c0_i32, %c0_i32_0 : i32, i32
  }
  func.func @transform_2(%arg0: i32) -> (i32, i32, i32) {
    %c0_i32 = arith.constant 0 : i32
    %c0_i32_0 = arith.constant 0 : i32
    %c0_i32_1 = arith.constant 0 : i32
    %c0_i32_2 = arith.constant 0 : i32
    return %c0_i32, %c0_i32_0, %c0_i32_1 : i32, i32, i32
  }
  func.func @transform_3(%arg0: i32) -> (i32, i32, i32) {
    %c0_i32 = arith.constant 0 : i32
    %c0_i32_0 = arith.constant 0 : i32
    %c0_i32_1 = arith.constant 0 : i32
    return %arg0, %c0_i32, %c0_i32_0 : i32, i32, i32
  }
  func.func @transform_4(%arg0: i32) -> (i32, i32, i32) {
    %c0_i32 = arith.constant 0 : i32
    %c0_i32_0 = arith.constant 0 : i32
    %c0_i32_1 = arith.constant 0 : i32
    return %arg0, %c0_i32, %c0_i32_0 : i32, i32, i32
  }
  func.func @transform_5(%arg0: i32) -> (i32, i32, i32) {
    %c0_i32 = arith.constant 0 : i32
    %c0_i32_0 = arith.constant 0 : i32
    %c0_i32_1 = arith.constant 0 : i32
    return %arg0, %c0_i32, %c0_i32_0 : i32, i32, i32
  }
  func.func @transform_6(%arg0: i32) -> (i32, i32, i32) {
    %c0_i32 = arith.constant 0 : i32
    %c0_i32_0 = arith.constant 0 : i32
    %c0_i32_1 = arith.constant 0 : i32
    return %arg0, %c0_i32, %c0_i32_0 : i32, i32, i32
  }
  func.func @transform_7(%arg0: i32) -> (i32, i32, i32) {
    %c0_i32 = arith.constant 0 : i32
    %c0_i32_0 = arith.constant 0 : i32
    %c0_i32_1 = arith.constant 0 : i32
    return %arg0, %c0_i32, %c0_i32_0 : i32, i32, i32
  }
  func.func @transform_8(%arg0: i32) -> (i32, i32, i32) {
    %c0_i32 = arith.constant 0 : i32
    %c0_i32_0 = arith.constant 0 : i32
    %c0_i32_1 = arith.constant 0 : i32
    return %arg0, %c0_i32, %c0_i32_0 : i32, i32, i32
  }
  func.func @transform_9(%arg0: i32) -> (i32, i32, i32) {
    %c0_i32 = arith.constant 0 : i32
    %c0_i32_0 = arith.constant 0 : i32
    %c0_i32_1 = arith.constant 0 : i32
    return %arg0, %c0_i32, %c0_i32_0 : i32, i32, i32
  }
  func.func @transform_10(%arg0: i32) -> (i32, i32, i32) {
    %c0_i32 = arith.constant 0 : i32
    %c0_i32_0 = arith.constant 0 : i32
    %c0_i32_1 = arith.constant 0 : i32
    return %arg0, %c0_i32, %c0_i32_0 : i32, i32, i32
  }
  func.func @transform_11(%arg0: i32) -> (i32, i32, i32) {
    %c0_i32 = arith.constant 0 : i32
    %c0_i32_0 = arith.constant 0 : i32
    %c0_i32_1 = arith.constant 0 : i32
    return %arg0, %c0_i32, %c0_i32_0 : i32, i32, i32
  }
  func.func @transform_12(%arg0: i32) -> (i32, i32, i32) {
    %c0_i32 = arith.constant 0 : i32
    %c0_i32_0 = arith.constant 0 : i32
    %c0_i32_1 = arith.constant 0 : i32
    return %arg0, %c0_i32, %c0_i32_0 : i32, i32, i32
  }
  func.func @transform_13(%arg0: i32) -> (i32, i32, i32) {
    %c0_i32 = arith.constant 0 : i32
    %c0_i32_0 = arith.constant 0 : i32
    %c0_i32_1 = arith.constant 0 : i32
    return %arg0, %c0_i32, %c0_i32_0 : i32, i32, i32
  }
  func.func @transform_14(%arg0: i32) -> (i32, i32, i32) {
    %c0_i32 = arith.constant 0 : i32
    %c0_i32_0 = arith.constant 0 : i32
    %c0_i32_1 = arith.constant 0 : i32
    return %arg0, %c0_i32, %c0_i32_0 : i32, i32, i32
  }
  func.func @transform_15(%arg0: i32) -> (i32, i32) {
    %c0_i32 = arith.constant 0 : i32
    %c0_i32_0 = arith.constant 0 : i32
    %c0_i32_1 = arith.constant 0 : i32
    return %c0_i32, %c0_i32_0 : i32, i32
  }
  func.func @transform_16(%arg0: i32) -> (i32, i32) {
    %c0_i32 = arith.constant 0 : i32
    %c0_i32_0 = arith.constant 0 : i32
    %c0_i32_1 = arith.constant 0 : i32
    return %c0_i32, %c0_i32_0 : i32, i32
  }
  func.func @transform_17(%arg0: i32) -> (i32, i32) {
    %c0_i32 = arith.constant 0 : i32
    %c0_i32_0 = arith.constant 0 : i32
    %c0_i32_1 = arith.constant 0 : i32
    return %c0_i32, %c0_i32_0 : i32, i32
  }
}

</mosaic_0001>

<bundles_post_ra>
// kernel: transformer_net_forward.1
= control target key start
LH: loop header
LB: loop body
LE: loop exit
PB: predicated region body
PF: predicated region fallthrough
CT: control target
= control target key end

     0   :  { %s5476_s24 = smov 0   ;;  %s6592_s0 = inlined_call_operand.vmem [shape: f32[16,28], index: 0, kind: input, shape index: {}]   ;;  %s6593_s1 = inlined_call_operand.vmem [shape: f32[224,16], index: 1, kind: input, shape index: {}]   ;;  %s6594_s2 = inlined_call_operand.vmem [shape: f32[14,16,28], index: 2, kind: input, shape index: {}]   ;;  %s6595_s3 = inlined_call_operand.vmem [shape: f32[6,28,84], index: 3, kind: input, shape index: {}]   ;;  %s6596_s4 = inlined_call_operand.vmem [shape: f32[6,1,84], index: 4, kind: input, shape index: {}]   ;;  %s6597_s5 = inlined_call_operand.vmem [shape: f32[6,28,28], index: 5, kind: input, shape index: {}]   ;;  %s6598_s6 = inlined_call_operand.vmem [shape: f32[6,1,28], index: 6, kind: input, shape index: {}]   ;;  %s6599_s7 = inlined_call_operand.vmem [shape: f32[6,1,28], index: 7, kind: input, shape index: {}]   ;;  %s6600_s8 = inlined_call_operand.vmem [shape: f32[6,1,28], index: 8, kind: input, shape index: {}]   ;;  %s6601_s9 = inlined_call_operand.vmem [shape: bf16[6,28,2048], index: 9, kind: input, shape index: {}]   ;;  %s6602_s10 = inlined_call_operand.vmem [shape: f32[6,1,2048], index: 10, kind: input, shape index: {}]   ;;  %s6603_s11 = inlined_call_operand.vmem [shape: bf16[6,2048,28], index: 11, kind: input, shape index: {}]   ;;  %s6604_s12 = inlined_call_operand.vmem [shape: f32[6,1,28], index: 12, kind: input, shape index: {}]   ;;  %s6605_s13 = inlined_call_operand.vmem [shape: f32[6,1,28], index: 13, kind: input, shape index: {}]   ;;  %s6606_s14 = inlined_call_operand.vmem [shape: f32[6,1,28], index: 14, kind: input, shape index: {}]   ;;  %s6607_s15 = inlined_call_operand.vmem [shape: f32[28,28], index: 15, kind: input, shape index: {}]   ;;  %s6608_s16 = inlined_call_operand.vmem [shape: f32[1,28], index: 16, kind: input, shape index: {}]   ;;  %s6609_s17 = inlined_call_operand.vmem [shape: f32[16,28], index: 17, kind: output, shape index: {}]  }
   0x1   :  { %6616 = sst [smem:[#allocation4_spill]] %s6592_s0 }
   0x2   :  { %6617 = sst [smem:[#allocation5_spill]] %s6593_s1 }
   0x3   :  { %6618 = sst [smem:[#allocation6_spill]] %s6594_s2 }
   0x4   :  { %6619 = sst [smem:[#allocation7_spill]] %s6595_s3 }
   0x5   :  { %6620 = sst [smem:[#allocation8_spill]] %s6597_s5 }
   0x6   :  { %6621 = sst [smem:[#allocation9_spill]] %s6601_s9 }
   0x7   :  { %6622 = sst [smem:[#allocation10_spill]] %s6607_s15 }
   0x8   :  { %6623 = sst [smem:[#allocation11_spill]] %s6608_s16 }
   0x9   :  { %6624 = sst [smem:[#allocation12_spill]] %s6609_s17 }
   0xa LB: > { %6625 = sst [smem:[#allocation3_spill]] %s5380_s24  ;;  %s5482_s25 = sadd.s32 4294967295, %s5380_s24   ;;  %s5380_s24 = sphi %s5476_s24, %s27_s24  }
   0xb   : > { %p4386_p0 = scmp.ge.s32.totalorder %s5380_s24, 1  ;;  %p577_p1 = scmp.lt.s32.totalorder %s5380_s24, 7 }
   0xd   : > { %p578_p2 = pnand %p4386_p0, %p577_p1 }
   0xe   : > { %p664_p3 = scmp.lt.s32.totalorder (!%p578_p2), %s5482_s25, 5  ;;  %s6626_s3 = sld [smem:[#allocation7_spill]] (!%p578_p2) }
   0xf   : > { %581 = sbr.rel (%p578_p2) target bundleno = 2841 (0xb19), region = 88  ;;  %s6627_s5 = sld [smem:[#allocation8_spill]] (!%p578_p2) }
  0x10   : > { %s6628_s9 = sld [smem:[#allocation9_spill]] (!%p578_p2)  ;;  %p4396_p4 = scmp.ne.s32.totalorder (!%p578_p2), %s5482_s25, 0 }
  0x16   : > { %s5488_s26 = scalar_select %p664_p3, %s5482_s25, 5 }
  0x17   : > { %713 = sbr.rel (%p4396_p4) target bundleno = 33 (0x21), region = 92  ;;  %s6629_s24 = sld [smem:[#allocation4_spill]] (!%p4396_p4)  ;;  %vm716_vm0 = vcmask (!%p4396_p4), 228352  }
  0x18   : > { %s4651_s27 = sshll.u32 %s5488_s26, 5  ;;  %s4653_s0 = sshll.u32 %s5488_s26, 8 }
  0x19   : > { %s668_s19 = scalar_lea.vmem %s6626_s3, %s4651_s27  ;;  %s5501_s21 = scalar_lea.vmem %s6627_s5, %s4651_s27 }
  0x1a   : > { %s5519_s3 = scalar_lea.vmem %s6628_s9, %s4653_s0  ;;  %s4393_s27 = sshll.u32 %s5488_s26, 4 }
  0x1b   : > { %s5525_s22 = scalar_lea.vmem %s6602_s10, %s4393_s27  ;;  %s4654_s23 = sshll.u32 %s5488_s26, 10 }
  0x1c   : > { %s5531_s17 = scalar_lea.vmem %s6603_s11, %s4654_s23  ;;  %s702_s29 = scalar_lea.vmem %s6604_s12, %s5488_s26 }
  0x1d   : > { %s705_s0 = scalar_lea.vmem %s6605_s13, %s5488_s26  ;;  %s708_s1 = scalar_lea.vmem %s6606_s14, %s5488_s26  ;;  %v714_v0 = vld [vmem:[%s6629_s24] sm:$0xff] (!%p4396_p4) }
  0x1e   : > { %s6630_s16 = smov %s6629_s24  ;;  %717 = vst.msk [vmem:[#allocation2] sm:$0xff] %vm716_vm0, %v714_v0 }
  0x1f   : > { %v715_v1 = vld [vmem:[%s6630_s16 + $0x8] sm:$0xff] }
  0x20   : > { %718 = vst.msk [vmem:[#allocation2 + $0x8] sm:$0xff] %vm716_vm0, %v715_v1 }
  0x21 PF: > { %v777_v2 = vld [vmem:[%s668_s19] sm:$0xff]  ;;  %v778_v3 = vld [vmem:[%s668_s19 + $0x8] sm:$0xff]  ;;  %v779_v4 = vld [vmem:[%s668_s19 + $0x10] sm:$0xff]  ;;  %vm795_vm1 = vcmask 1043456   ;;  %vm788_vm2 = vcmask 228352   ;;  %vm5382_vm3 = vmmov 1   ;;  %s6633_s15 = scalar_lea.vmem %s6596_s4, %s5488_s26  ;;  %s6637_s20 = scalar_lea.vmem %s6599_s7, %s5488_s26 }
  0x22   : > { %v5034_v5 = vpack.c.bf16 %v778_v3, %v777_v2  ;;  %v780_v6 = vld [vmem:[%s668_s19 + $0x18] sm:$0xf]  ;;  %vm5552_vm4 = vmpackc.low %vm795_vm1, %vm5382_vm3  ;;  %v4397_v11 = vld [vmem:[%s6633_s15] ss:$0 sm:$0xff]  ;;  %s6634_s28 = sld [smem:[#allocation6_spill]]  ;;  %s5383_s30 = smov 100  }
  0x23   : > { %v5038_v8 = vpack.c.bf16 %v780_v6, %v779_v4  ;;  %vm5045_vm5 = vmpackc.low %vm788_vm2, %vm788_vm2  ;;  %s6635_s27 = sld [smem:[#allocation5_spill]]  ;;  %vm1201_vm6 = vcmask 130048   ;;  %s5384_s9 = smov 72   ;;  %vm2293_vm7 = vcmask 1045504  }
  0x24   : > { %5035 = vmatprep.subr.bf16.mxu0 %v5034_v5  ;;  %s6638_s5 = scalar_lea.vmem %s6600_s8, %s5488_s26  ;;  %p4644_p5 = scmp.ne.s32.totalorder %s5482_s25, 5 }
  0x25   : > { %5037 = vmatpush3.bf16.msra.mxu0 %v5034_v5  ;;  %s6639_s2 = sld [smem:[#allocation10_spill]] (!%p4644_p5)  ;;  %s6640_s23 = sld [smem:[#allocation11_spill]] (!%p4644_p5) }
  0x26   : > { %5040 = vmatprep.subr.msk.bf16.mxu0 %vm5552_vm4, %v5038_v8 }
  0x27   : > { %v720_v10 = vld [vmem:[#allocation2 + $0x8] sm:$0xff] }
  0x28   : > { %v719_v7 = vld [vmem:[#allocation2] sm:$0xff]  ;;  %v722_v23 = vld [vmem:[%s6634_s28 + $0x8] sm:$0xff]  ;;  %v723_v24 = vld [vmem:[%s6634_s28 + $0x10] sm:$0xff] }
  0x29   : > { %4917 = vmatprep.mubr.msk.f32.mxu0 %vm788_vm2, %v719_v7  ;;  %5043 = vmatpush3.bf16.msk.msra.mxu0 %vm5552_vm4, %v5038_v8  ;;  %v721_v15 = vld [vmem:[%s6634_s28] sm:$0xff]  ;;  %v724_v27 = vld [vmem:[%s6634_s28 + $0x18] sm:$0xff]  ;;  %v726_v31 = vld [vmem:[%s6634_s28 + $0x28] sm:$0xff] }
  0x2a   : > { %v725_v28 = vld [vmem:[%s6634_s28 + $0x20] sm:$0xff]  ;;  %v727_v32 = vld [vmem:[%s6634_s28 + $0x30] sm:$0xff]  ;;  %v728_v35 = vld [vmem:[%s6634_s28 + $0x38] sm:$0xff] }
  0x2b   : > { %v729_v36 = vld [vmem:[%s6634_s28 + $0x40] sm:$0xff]  ;;  %v730_v39 = vld [vmem:[%s6634_s28 + $0x48] sm:$0xff]  ;;  %v731_v40 = vld [vmem:[%s6634_s28 + $0x50] sm:$0xff] }
  0x2c   : > { %4918 = vmatmul.mubr.msk.f32.vlgmr.msra.gmra.mrb[0].mxu0 %vm788_vm2, %v720_v10  ;;  %v732_v43 = vld [vmem:[%s6634_s28 + $0x58] sm:$0xff]  ;;  %v733_v44 = vld [vmem:[%s6634_s28 + $0x60] sm:$0xff]  ;;  %v734_v47 = vld [vmem:[%s6634_s28 + $0x68] sm:$0xff] }
  0x2d   : > { %v735_v48 = vld [vmem:[%s6634_s28 + $0x70] sm:$0xff]  ;;  %v736_v51 = vld [vmem:[%s6634_s28 + $0x78] sm:$0xff]  ;;  %v737_v52 = vld [vmem:[%s6634_s28 + $0x80] sm:$0xff] }
  0x2e   : > { %v738_v55 = vld [vmem:[%s6634_s28 + $0x88] sm:$0xff]  ;;  %v739_v56 = vld [vmem:[%s6634_s28 + $0x90] sm:$0xff]  ;;  %v740_v59 = vld [vmem:[%s6634_s28 + $0x98] sm:$0xff] }
  0x2f   : > { %v741_v60 = vld [vmem:[%s6634_s28 + $0xa0] sm:$0xff]  ;;  %v742_v63 = vld [vmem:[%s6634_s28 + $0xa8] sm:$0xff]  ;;  %v743_v0 = vld [vmem:[%s6634_s28 + $0xb0] sm:$0xff] }
  0x30   : > { %v744_v3 = vld [vmem:[%s6634_s28 + $0xb8] sm:$0xff]  ;;  %v745_v4 = vld [vmem:[%s6634_s28 + $0xc0] sm:$0xff]  ;;  %v746_v7 = vld [vmem:[%s6634_s28 + $0xc8] sm:$0xff] }
  0x31   : > { %v747_v8 = vld [vmem:[%s6634_s28 + $0xd0] sm:$0xff] }
  0xff   : > { %v4919_v12 = vpop.f32.mrb[0].mxu0 }
 0x100   : > { %v5567_v13 = vadd.f32 %v4919_v12, %v4397_v11  ;;  %v865_v14 = vpop.f32.mrb[1].mxu0  ;;  %v748_v12 = vld [vmem:[%s6634_s28 + $0xd8] sm:$0xff] }
 0x101   : > { %v5572_v16 = vadd.f32 %v4397_v11, %v865_v14 }
 0x102   : > { %v875_v25 = vmul.f32 %v5567_v13, %v722_v23  ;;  %v877_v29 = vmul.f32 %v5567_v13, %v724_v27  ;;  %v879_v33 = vmul.f32 %v5567_v13, %v726_v31  ;;  %v881_v37 = vmul.f32 %v5567_v13, %v728_v35  ;;  %v753_v35 = vld [vmem:[%s6635_s27 + $0x20] sm:$0xff] }
 0x103   : > { %v5576_v17 = vpack.i.bf16 %v5567_v13, %v5572_v16  ;;  %v874_v18 = vmul.f32 %v5572_v16, %v721_v15  ;;  %v876_v26 = vmul.f32 %v5572_v16, %v723_v24  ;;  %v878_v30 = vmul.f32 %v5572_v16, %v725_v28  ;;  %v750_v15 = vld [vmem:[%s6635_s27 + $0x8] sm:$0xff]  ;;  %v751_v24 = vld [vmem:[%s6635_s27 + $0x10] sm:$0xff] }
 0x104   : > { %v880_v34 = vmul.f32 %v5572_v16, %v727_v32  ;;  %v882_v38 = vmul.f32 %v5572_v16, %v729_v36  ;;  %v883_v41 = vmul.f32 %v5567_v13, %v730_v39  ;;  %v884_v42 = vmul.f32 %v5572_v16, %v731_v40  ;;  %v756_v40 = vld [vmem:[%s6635_s27 + $0x38] sm:$0xff] }
 0x105   : > { %5087 = vrot.lane.b32.xlu0 %v5576_v17, %s5383_s30  ;;  %4924 = vmatprep.mubr.msk.f32.mxu1 %vm788_vm2, %v874_v18  ;;  %v885_v45 = vmul.f32 %v5567_v13, %v732_v43  ;;  %v886_v46 = vmul.f32 %v5572_v16, %v733_v44  ;;  %v887_v49 = vmul.f32 %v5567_v13, %v734_v47  ;;  %s6636_s30 = scalar_lea.vmem %s6598_s6, %s5488_s26 }
 0x106   : > { %v888_v50 = vmul.f32 %v5572_v16, %v735_v48  ;;  %v889_v53 = vmul.f32 %v5567_v13, %v736_v51  ;;  %v890_v54 = vmul.f32 %v5572_v16, %v737_v52  ;;  %v891_v57 = vmul.f32 %v5567_v13, %v738_v55  ;;  %v761_v52 = vld [vmem:[%s6635_s27 + $0x60] sm:$0xff] }
 0x107   : > { %v892_v58 = vmul.f32 %v5572_v16, %v739_v56  ;;  %v893_v61 = vmul.f32 %v5567_v13, %v740_v59  ;;  %v894_v62 = vmul.f32 %v5572_v16, %v741_v60  ;;  %v895_v1 = vmul.f32 %v5567_v13, %v742_v63  ;;  %v763_v60 = vld [vmem:[%s6635_s27 + $0x70] sm:$0xff] }
 0x108   : > { %v896_v2 = vmul.f32 %v5572_v16, %v743_v0  ;;  %v897_v5 = vmul.f32 %v5567_v13, %v744_v3  ;;  %v898_v6 = vmul.f32 %v5572_v16, %v745_v4  ;;  %v899_v10 = vmul.f32 %v5567_v13, %v746_v7  ;;  %v765_v4 = vld [vmem:[%s6635_s27 + $0x80] sm:$0xff] }
 0x109   : > { %v900_v11 = vmul.f32 %v5572_v16, %v747_v8  ;;  %v901_v14 = vmul.f32 %v5567_v13, %v748_v12  ;;  %v749_v16 = vld [vmem:[%s6635_s27] sm:$0xff]  ;;  %v752_v13 = vld [vmem:[%s6635_s27 + $0x18] sm:$0xff] }
 0x177   : > { %v5088_v19 = vpop.permute.xlu0 %5087 }
 0x178   : > { %v5090_v20 = vunpack.i.h.bf16 %v5088_v19  ;;  %v5089_v21 = vunpack.i.l.bf16 %v5088_v19 }
 0x17a   : > { %v5044_v22 = vpack.c.bf16 %v5090_v20, %v5089_v21 }
 0x17c   : > { %5046 = vmatprep.subr.msk.bf16.mxu1 %vm5045_vm5, %v5044_v22 }
 0x17d   : > { %5049 = vmatpush3.bf16.xpose.msk.msra.mxu1 %vm5045_vm5, %v5044_v22 }
 0x184   : > { %4925 = vmatmul.mubr.msk.f32.vlgmr.msra.gmra.mrb[0].mxu1 %vm788_vm2, %v875_v25 }
 0x185   : > { %4927 = vmatprep.mubr.msk.f32.mxu1 %vm788_vm2, %v876_v26 }
 0x188   : > { %4928 = vmatmul.mubr.msk.f32.gmra.mrb[2].mxu1 %vm788_vm2, %v877_v29 }
 0x189   : > { %4930 = vmatprep.mubr.msk.f32.mxu1 %vm788_vm2, %v878_v30  ;;  %v754_v30 = vld [vmem:[%s6635_s27 + $0x28] sm:$0xff] }
 0x18c   : > { %4931 = vmatmul.mubr.msk.f32.gmra.mrb[4].mxu1 %vm788_vm2, %v879_v33 }
 0x18d   : > { %4933 = vmatprep.mubr.msk.f32.mxu1 %vm788_vm2, %v880_v34 }
 0x190   : > { %4934 = vmatmul.mubr.msk.f32.gmra.mrb[6].mxu1 %vm788_vm2, %v881_v37 }
 0x191   : > { %4936 = vmatprep.mubr.msk.f32.mxu1 %vm788_vm2, %v882_v38 }
 0x194   : > { %4937 = vmatmul.mubr.msk.f32.gmra.mrb[8].mxu1 %vm788_vm2, %v883_v41 }
 0x195   : > { %4939 = vmatprep.mubr.msk.f32.mxu1 %vm788_vm2, %v884_v42 }
 0x198   : > { %4940 = vmatmul.mubr.msk.f32.gmra.mrb[10].mxu1 %vm788_vm2, %v885_v45  ;;  %v759_v45 = vld [vmem:[%s6635_s27 + $0x50] sm:$0xff] }
 0x199   : > { %4942 = vmatprep.mubr.msk.f32.mxu1 %vm788_vm2, %v886_v46  ;;  %v755_v46 = vld [vmem:[%s6635_s27 + $0x30] sm:$0xff] }
 0x19c   : > { %4943 = vmatmul.mubr.msk.f32.gmra.mrb[12].mxu1 %vm788_vm2, %v887_v49 }
 0x19d   : > { %4945 = vmatprep.mubr.msk.f32.mxu1 %vm788_vm2, %v888_v50 }
 0x1a0   : > { %4946 = vmatmul.mubr.msk.f32.gmra.mrb[14].mxu1 %vm788_vm2, %v889_v53  ;;  %v757_v53 = vld [vmem:[%s6635_s27 + $0x40] sm:$0xff] }
 0x1a1   : > { %4948 = vmatprep.mubr.msk.f32.mxu1 %vm788_vm2, %v890_v54 }
 0x1a4   : > { %4949 = vmatmul.mubr.msk.f32.gmra.mrb[16].mxu1 %vm788_vm2, %v891_v57 }
 0x1a5   : > { %4951 = vmatprep.mubr.msk.f32.mxu1 %vm788_vm2, %v892_v58 }
 0x1a8   : > { %4952 = vmatmul.mubr.msk.f32.gmra.mrb[18].mxu1 %vm788_vm2, %v893_v61  ;;  %v758_v61 = vld [vmem:[%s6635_s27 + $0x48] sm:$0xff] }
 0x1a9   : > { %4954 = vmatprep.mubr.msk.f32.mxu1 %vm788_vm2, %v894_v62 }
 0x1ac   : > { %4955 = vmatmul.mubr.msk.f32.gmra.mrb[20].mxu1 %vm788_vm2, %v895_v1 }
 0x1ad   : > { %4957 = vmatprep.mubr.msk.f32.mxu1 %vm788_vm2, %v896_v2 }
 0x1b0   : > { %4958 = vmatmul.mubr.msk.f32.gmra.mrb[22].mxu1 %vm788_vm2, %v897_v5  ;;  %v760_v5 = vld [vmem:[%s6635_s27 + $0x58] sm:$0xff] }
 0x1b1   : > { %4960 = vmatprep.mubr.msk.f32.mxu1 %vm788_vm2, %v898_v6 }
 0x1b4   : > { %4961 = vmatmul.mubr.msk.f32.gmra.mrb[24].mxu1 %vm788_vm2, %v899_v10 }
 0x1b5   : > { %4963 = vmatprep.mubr.msk.f32.mxu1 %vm788_vm2, %v900_v11 }
 0x1b8   : > { %4964 = vmatmul.mubr.msk.f32.gmra.mrb[26].mxu1 %vm788_vm2, %v901_v14  ;;  %v767_v14 = vld [vmem:[%s6635_s27 + $0x90] sm:$0xff] }
 0x257   : > { %v4926_v18 = vpop.f32.mrb[0].mxu1 }
 0x258   : > { %v5724_v19 = vadd.f32 %v4926_v18, %v750_v15  ;;  %v1062_v20 = vpop.f32.mrb[1].mxu1  ;;  %v762_v15 = vld [vmem:[%s6635_s27 + $0x68] sm:$0xff] }
 0x259   : > { %v5726_v21 = vadd.f32 %v1062_v20, %v749_v16 }
 0x25a   : > { %v1205_v22 = vsel %vm1201_vm6, %v5724_v19, -inf }
 0x25b   : > { %1206 = vmax.xlane.f32.xlu1 %v1205_v22  ;;  %v4929_v23 = vpop.f32.mrb[2].mxu1  ;;  %v1202_v25 = vsel %vm1201_vm6, %v5726_v21, -inf }
 0x25c   : > { %v5738_v26 = vadd.f32 %v4929_v23, %v752_v13  ;;  %v1072_v27 = vpop.f32.mrb[3].mxu1  ;;  %1203 = vmax.xlane.f32.xlu0 %v1202_v25  ;;  %v764_v25 = vld [vmem:[%s6635_s27 + $0x78] sm:$0xff] }
 0x25d   : > { %v5740_v28 = vadd.f32 %v1072_v27, %v751_v24  ;;  %v769_v24 = vld [vmem:[%s6635_s27 + $0xa0] sm:$0xff] }
 0x25e   : > { %v1211_v29 = vsel %vm1201_vm6, %v5738_v26, -inf }
 0x25f   : > { %1212 = vmax.xlane.f32.xlu1 %v1211_v29  ;;  %v4932_v31 = vpop.f32.mrb[4].mxu1  ;;  %v1208_v34 = vsel %vm1201_vm6, %v5740_v28, -inf }
 0x260   : > { %v1082_v32 = vpop.f32.mrb[5].mxu1  ;;  %v5747_v33 = vadd.f32 %v4932_v31, %v754_v30 }
 0x261   : > { %v5754_v38 = vadd.f32 %v1082_v32, %v753_v35  ;;  %v771_v35 = vld [vmem:[%s6635_s27 + $0xb0] sm:$0xff] }
 0x262   : > { %v1217_v39 = vsel %vm1201_vm6, %v5747_v33, -inf }
 0x263   : > { %v4935_v36 = vpop.f32.mrb[6].mxu1  ;;  %1209 = vmax.xlane.f32.xlu1 %v1208_v34  ;;  %v1214_v44 = vsel %vm1201_vm6, %v5754_v38, -inf }
 0x264   : > { %v1092_v37 = vpop.f32.mrb[7].mxu1  ;;  %v5761_v43 = vadd.f32 %v4935_v36, %v756_v40  ;;  %v766_v36 = vld [vmem:[%s6635_s27 + $0x88] sm:$0xff] }
 0x265   : > { %v5773_v50 = vadd.f32 %v1092_v37, %v755_v46  ;;  %v768_v46 = vld [vmem:[%s6635_s27 + $0x98] sm:$0xff] }
 0x266   : > { %v1223_v51 = vsel %vm1201_vm6, %v5761_v43, -inf }
 0x267   : > { %v4938_v41 = vpop.f32.mrb[8].mxu1  ;;  %1218 = vmax.xlane.f32.xlu1 %v1217_v39  ;;  %v1220_v59 = vsel %vm1201_vm6, %v5773_v50, -inf }
 0x268   : > { %v1102_v42 = vpop.f32.mrb[9].mxu1  ;;  %v5801_v2 = vadd.f32 %v4938_v41, %v758_v61 }
 0x269   : > { %v5787_v58 = vadd.f32 %v1102_v42, %v757_v53 }
 0x26a   : > { %v1229_v12 = vsel %vm1201_vm6, %v5801_v2, -inf }
 0x26b   : > { %v4941_v47 = vpop.f32.mrb[10].mxu1  ;;  %1215 = vmax.xlane.f32.xlu1 %v1214_v44  ;;  %v1226_v3 = vsel %vm1201_vm6, %v5787_v58, -inf }
 0x26c   : > { %v1112_v48 = vpop.f32.mrb[11].mxu1  ;;  %v5815_v11 = vadd.f32 %v4941_v47, %v760_v5 }
 0x26d   : > { %v5771_v49 = vadd.f32 %v1112_v48, %v759_v45  ;;  %v773_v45 = vld [vmem:[%s6635_s27 + $0xc0] sm:$0xff] }
 0x26e   : > { %v1235_v23 = vsel %vm1201_vm6, %v5815_v11, -inf }
 0x26f   : > { %v4944_v54 = vpop.f32.mrb[12].mxu1  ;;  %1224 = vmax.xlane.f32.xlu1 %v1223_v51  ;;  %v1232_v55 = vsel %vm1201_vm6, %v5771_v49, -inf }
 0x270   : > { %v1122_v56 = vpop.f32.mrb[13].mxu1  ;;  %1233 = vmax.xlane.f32.xlu0 %v1232_v55  ;;  %v5829_v22 = vadd.f32 %v4944_v54, %v762_v15  ;;  %v775_v55 = vld [vmem:[%s6635_s27 + $0xd0] sm:$0xff] }
 0x271   : > { %v5785_v57 = vadd.f32 %v1122_v56, %v761_v52  ;;  %v770_v56 = vld [vmem:[%s6635_s27 + $0xa8] sm:$0xff] }
 0x272   : > { %v1241_v34 = vsel %vm1201_vm6, %v5829_v22, -inf }
 0x273   : > { %v4947_v62 = vpop.f32.mrb[14].mxu1  ;;  %1221 = vmax.xlane.f32.xlu1 %v1220_v59  ;;  %v1238_v63 = vsel %vm1201_vm6, %v5785_v57, -inf }
 0x274   : > { %v1132_v0 = vpop.f32.mrb[15].mxu1  ;;  %1239 = vmax.xlane.f32.xlu0 %v1238_v63  ;;  %v5843_v32 = vadd.f32 %v4947_v62, %v764_v25 }
 0x275   : > { %v5799_v1 = vadd.f32 %v1132_v0, %v763_v60 }
 0x276   : > { %v1247_v44 = vsel %vm1201_vm6, %v5843_v32, -inf }
 0x277   : > { %v4950_v6 = vpop.f32.mrb[16].mxu1  ;;  %1227 = vmax.xlane.f32.xlu1 %v1226_v3  ;;  %v1244_v7 = vsel %vm1201_vm6, %v5799_v1, -inf  ;;  %v772_v3 = vld [vmem:[%s6635_s27 + $0xb8] sm:$0xff] }
 0x278   : > { %v1142_v8 = vpop.f32.mrb[17].mxu1  ;;  %1245 = vmax.xlane.f32.xlu0 %v1244_v7  ;;  %v5857_v42 = vadd.f32 %v4950_v6, %v766_v36  ;;  %v774_v7 = vld [vmem:[%s6635_s27 + $0xc8] sm:$0xff] }
 0x279   : > { %v5813_v10 = vadd.f32 %v1142_v8, %v765_v4 }
 0x27a   : > { %v1253_v54 = vsel %vm1201_vm6, %v5857_v42, -inf }
 0x27b   : > { %v4953_v16 = vpop.f32.mrb[18].mxu1  ;;  %1230 = vmax.xlane.f32.xlu1 %v1229_v12  ;;  %v1250_v18 = vsel %vm1201_vm6, %v5813_v10, -inf }
 0x27c   : > { %v1152_v20 = vpop.f32.mrb[19].mxu1  ;;  %1251 = vmax.xlane.f32.xlu0 %v1250_v18  ;;  %v5871_v53 = vadd.f32 %v4953_v16, %v768_v46 }
 0x27d   : > { %v5827_v13 = vadd.f32 %v1152_v20, %v767_v14  ;;  %v776_v14 = vld [vmem:[%s6635_s27 + $0xd8] sm:$0xff] }
 0x27e   : > { %v1259_v0 = vsel %vm1201_vm6, %v5871_v53, -inf }
 0x27f   : > { %v4956_v27 = vpop.f32.mrb[20].mxu1  ;;  %1236 = vmax.xlane.f32.xlu1 %v1235_v23  ;;  %v1256_v29 = vsel %vm1201_vm6, %v5827_v13, -inf }
 0x280   : > { %v1162_v30 = vpop.f32.mrb[21].mxu1  ;;  %1257 = vmax.xlane.f32.xlu0 %v1256_v29  ;;  %v5885_v63 = vadd.f32 %v4956_v27, %v770_v56 }
 0x281   : > { %v5841_v31 = vadd.f32 %v1162_v30, %v769_v24 }
 0x282   : > { %v1265_v6 = vsel %vm1201_vm6, %v5885_v63, -inf }
 0x283   : > { %v4959_v37 = vpop.f32.mrb[22].mxu1  ;;  %1242 = vmax.xlane.f32.xlu1 %v1241_v34  ;;  %v1262_v39 = vsel %vm1201_vm6, %v5841_v31, -inf }
 0x284   : > { %v1172_v40 = vpop.f32.mrb[23].mxu1  ;;  %1263 = vmax.xlane.f32.xlu0 %v1262_v39  ;;  %v5894_v5 = vadd.f32 %v4959_v37, %v772_v3 }
 0x285   : > { %v5855_v41 = vadd.f32 %v1172_v40, %v771_v35 }
 0x286   : > { %v1271_v12 = vsel %vm1201_vm6, %v5894_v5, -inf }
 0x287   : > { %v4962_v47 = vpop.f32.mrb[24].mxu1  ;;  %1248 = vmax.xlane.f32.xlu1 %v1247_v44  ;;  %v1268_v48 = vsel %vm1201_vm6, %v5855_v41, -inf }
 0x288   : > { %v1182_v51 = vpop.f32.mrb[25].mxu1  ;;  %1269 = vmax.xlane.f32.xlu0 %v1268_v48  ;;  %v5901_v8 = vadd.f32 %v4962_v47, %v774_v7 }
 0x289   : > { %v5869_v52 = vadd.f32 %v1182_v51, %v773_v45 }
 0x28a   : > { %v1277_v16 = vsel %vm1201_vm6, %v5901_v8, -inf }
 0x28b   : > { %v4965_v59 = vpop.f32.mrb[26].mxu1  ;;  %1254 = vmax.xlane.f32.xlu1 %v1253_v54  ;;  %v1274_v60 = vsel %vm1201_vm6, %v5869_v52, -inf }
 0x28c   : > { %v1192_v61 = vpop.f32.mrb[27].mxu1  ;;  %1275 = vmax.xlane.f32.xlu0 %v1274_v60  ;;  %v5908_v15 = vadd.f32 %v4965_v59, %v776_v14 }
 0x28d   : > { %v5883_v62 = vadd.f32 %v1192_v61, %v775_v55 }
 0x28e   : > { %v1283_v18 = vsel %vm1201_vm6, %v5908_v15, -inf }
 0x28f   : > { %1260 = vmax.xlane.f32.xlu1 %v1259_v0  ;;  %v1280_v4 = vsel %vm1201_vm6, %v5883_v62, -inf }
 0x290   : > { %1281 = vmax.xlane.f32.xlu0 %v1280_v4 }
 0x293   : > { %1266 = vmax.xlane.f32.xlu1 %v1265_v6 }
 0x297   : > { %1272 = vmax.xlane.f32.xlu1 %v1271_v12 }
 0x29b   : > { %1278 = vmax.xlane.f32.xlu1 %v1277_v16 }
 0x29f   : > { %1284 = vmax.xlane.f32.xlu1 %v1283_v18 }
 0x2e8   : > { %v1207_v20 = vpop.xlane.xlu1 %1206 }
 0x2e9   : > { %v1287_v23 = vsub.f32 %v5724_v19, %v1207_v20  ;;  %v1204_v24 = vpop.xlane.xlu0 %1203 }
 0x2ea   : > { %v1286_v25 = vsub.f32 %v5726_v21, %v1204_v24 }
 0x2eb   : > { %v1316_v27 = vmul.f32 1.442695, %v1287_v23 }
 0x2ec   : > { %v1314_v29 = vmul.f32 1.442695, %v1286_v25  ;;  %v1213_v30 = vpop.xlane.xlu1 %1212 }
 0x2ed   : > { %5224 = vpow2.f32 %v1316_v27  ;;  %v1289_v34 = vsub.f32 %v5738_v26, %v1213_v30 }
 0x2ee   : > { %5226 = vpow2.f32 %v1314_v29 }
 0x2ef   : > { %v1320_v35 = vmul.f32 1.442695, %v1289_v34 }
 0x2f0   : > { %v1210_v36 = vpop.xlane.xlu1 %1209 }
 0x2f1   : > { %5228 = vpow2.f32 %v1320_v35  ;;  %v1288_v37 = vsub.f32 %v5740_v28, %v1210_v36 }
 0x2f3   : > { %v1318_v39 = vmul.f32 1.442695, %v1288_v37 }
 0x2f4   : > { %v1219_v40 = vpop.xlane.xlu1 %1218 }
 0x2f5   : > { %5230 = vpow2.f32 %v1318_v39  ;;  %v1291_v19 = vsub.f32 %v5747_v33, %v1219_v40 }
 0x2f7   : > { %v5919_v44 = vpop.eup %5224  ;;  %v1324_v21 = vmul.f32 1.442695, %v1291_v19 }
 0x2f8   : > { %v5921_v45 = vpop.eup %5226  ;;  %v1216_v46 = vpop.xlane.xlu1 %1215  ;;  %v1373_v26 = vsel %vm1201_vm6, %v5919_v44, 0.0 }
 0x2f9   : > { %5232 = vpow2.f32 %v1324_v21  ;;  %v1290_v47 = vsub.f32 %v5754_v38, %v1216_v46  ;;  %1374 = vadd.xlane.f32.xlu1 %v1373_v26  ;;  %v1370_v28 = vsel %vm1201_vm6, %v5921_v45, 0.0 }
 0x2fa   : > { %1371 = vadd.xlane.f32.xlu0 %v1370_v28 }
 0x2fb   : > { %v5928_v48 = vpop.eup %5228  ;;  %v1322_v33 = vmul.f32 1.442695, %v1290_v47 }
 0x2fc   : > { %v1225_v51 = vpop.xlane.xlu1 %1224  ;;  %v1379_v54 = vsel %vm1201_vm6, %v5928_v48, 0.0 }
 0x2fd   : > { %5234 = vpow2.f32 %v1322_v33  ;;  %v1293_v55 = vsub.f32 %v5761_v43, %v1225_v51  ;;  %1380 = vadd.xlane.f32.xlu1 %v1379_v54  ;;  %v1234_v38 = vpop.xlane.xlu0 %1233 }
 0x2fe   : > { %v1296_v4 = vsub.f32 %v5771_v49, %v1234_v38 }
 0x2ff   : > { %v5933_v56 = vpop.eup %5230  ;;  %v1328_v59 = vmul.f32 1.442695, %v1293_v55 }
 0x300   : > { %v1222_v60 = vpop.xlane.xlu1 %1221  ;;  %v1376_v61 = vsel %vm1201_vm6, %v5933_v56, 0.0  ;;  %v1334_v16 = vmul.f32 1.442695, %v1296_v4 }
 0x301   : > { %5236 = vpow2.f32 %v1328_v59  ;;  %v1292_v0 = vsub.f32 %v5773_v50, %v1222_v60  ;;  %1377 = vadd.xlane.f32.xlu0 %v1376_v61  ;;  %v1240_v25 = vpop.xlane.xlu0 %1239 }
 0x302   : > { %v1298_v34 = vsub.f32 %v5785_v57, %v1240_v25 }
 0x303   : > { %v5938_v3 = vpop.eup %5232  ;;  %v1326_v6 = vmul.f32 1.442695, %v1292_v0 }
 0x304   : > { %v1228_v7 = vpop.xlane.xlu1 %1227  ;;  %v1385_v43 = vsel %vm1201_vm6, %v5938_v3, 0.0  ;;  %v1338_v40 = vmul.f32 1.442695, %v1298_v34 }
 0x305   : > { %5238 = vpow2.f32 %v1326_v6  ;;  %v1294_v12 = vsub.f32 %v5787_v58, %v1228_v7  ;;  %1386 = vadd.xlane.f32.xlu1 %v1385_v43  ;;  %v1246_v21 = vpop.xlane.xlu0 %1245 }
 0x307   : > { %v5944_v14 = vpop.eup %5234  ;;  %v1330_v18 = vmul.f32 1.442695, %v1294_v12 }
 0x308   : > { %v1231_v20 = vpop.xlane.xlu1 %1230  ;;  %v1382_v50 = vsel %vm1201_vm6, %v5944_v14, 0.0 }
 0x309   : > { %5240 = vpow2.f32 %v1330_v18  ;;  %v1295_v49 = vsub.f32 %v5801_v2, %v1231_v20  ;;  %1383 = vadd.xlane.f32.xlu0 %v1382_v50 }
 0x30a   : > { %5242 = vpow2.f32 %v1334_v16 }
 0x30b   : > { %v5949_v23 = vpop.eup %5236  ;;  %v1332_v24 = vmul.f32 1.442695, %v1295_v49 }
 0x30c   : > { %v1237_v27 = vpop.xlane.xlu1 %1236  ;;  %v1391_v58 = vsel %vm1201_vm6, %v5949_v23, 0.0 }
 0x30d   : > { %5244 = vpow2.f32 %v1332_v24  ;;  %v1297_v29 = vsub.f32 %v5815_v11, %v1237_v27  ;;  %1392 = vadd.xlane.f32.xlu1 %v1391_v58 }
 0x30f   : > { %v5954_v30 = vpop.eup %5238  ;;  %v1336_v35 = vmul.f32 1.442695, %v1297_v29 }
 0x310   : > { %v1243_v2 = vpop.xlane.xlu1 %1242  ;;  %v1388_v36 = vsel %vm1201_vm6, %v5954_v30, 0.0 }
 0x311   : > { %5246 = vpow2.f32 %v1336_v35  ;;  %v1299_v37 = vsub.f32 %v5829_v22, %v1243_v2  ;;  %1389 = vadd.xlane.f32.xlu0 %v1388_v36  ;;  %v1300_v22 = vsub.f32 %v5799_v1, %v1246_v21 }
 0x313   : > { %v5960_v39 = vpop.eup %5240  ;;  %v1340_v19 = vmul.f32 1.442695, %v1299_v37  ;;  %v1342_v59 = vmul.f32 1.442695, %v1300_v22 }
 0x314   : > { %v1249_v11 = vpop.xlane.xlu1 %1248  ;;  %v1394_v46 = vsel %vm1201_vm6, %v5960_v39, 0.0  ;;  %v5964_v26 = vpop.eup %5242 }
 0x315   : > { %5248 = vpow2.f32 %v1340_v19  ;;  %v1301_v57 = vsub.f32 %v5843_v32, %v1249_v11  ;;  %1395 = vadd.xlane.f32.xlu0 %v1394_v46  ;;  %v1400_v54 = vsel %vm1201_vm6, %v5964_v26, 0.0  ;;  %v1252_v32 = vpop.xlane.xlu0 %1251 }
 0x316   : > { %5250 = vpow2.f32 %v1338_v40  ;;  %v1302_v0 = vsub.f32 %v5813_v10, %v1252_v32 }
 0x317   : > { %v5967_v47 = vpop.eup %5244  ;;  %v1344_v28 = vmul.f32 1.442695, %v1301_v57 }
 0x318   : > { %v1255_v33 = vpop.xlane.xlu1 %1254  ;;  %v1397_v51 = vsel %vm1201_vm6, %v5967_v47, 0.0  ;;  %v1346_v12 = vmul.f32 1.442695, %v1302_v0 }
 0x319   : > { %1398 = vadd.xlane.f32.xlu1 %v1397_v51  ;;  %1401 = vadd.xlane.f32.xlu0 %v1400_v54  ;;  %5252 = vpow2.f32 %v1344_v28  ;;  %v1303_v38 = vsub.f32 %v5857_v42, %v1255_v33  ;;  %v1258_v43 = vpop.xlane.xlu0 %1257 }
 0x31a   : > { %5254 = vpow2.f32 %v1342_v59  ;;  %v1304_v57 = vsub.f32 %v5827_v13, %v1258_v43 }
 0x31b   : > { %v5974_v55 = vpop.eup %5246  ;;  %v1348_v4 = vmul.f32 1.442695, %v1303_v38 }
 0x31c   : > { %v1403_v1 = vsel %vm1201_vm6, %v5974_v55, 0.0  ;;  %v1261_v60 = vpop.xlane.xlu1 %1260  ;;  %v1350_v54 = vmul.f32 1.442695, %v1304_v57 }
 0x31d   : > { %1404 = vadd.xlane.f32.xlu1 %v1403_v1  ;;  %5256 = vpow2.f32 %v1348_v4  ;;  %v1305_v42 = vsub.f32 %v5871_v53, %v1261_v60  ;;  %v1264_v10 = vpop.xlane.xlu0 %1263 }
 0x31e   : > { %5258 = vpow2.f32 %v1346_v12  ;;  %v1306_v53 = vsub.f32 %v5841_v31, %v1264_v10 }
 0x31f   : > { %v5979_v61 = vpop.eup %5248  ;;  %v1352_v50 = vmul.f32 1.442695, %v1305_v42 }
 0x320   : > { %v1409_v6 = vsel %vm1201_vm6, %v5979_v61, 0.0  ;;  %v5984_v7 = vpop.eup %5250  ;;  %v1267_v16 = vpop.xlane.xlu1 %1266  ;;  %v1354_v2 = vmul.f32 1.442695, %v1306_v53 }
 0x321   : > { %1410 = vadd.xlane.f32.xlu1 %v1409_v6  ;;  %v1406_v18 = vsel %vm1201_vm6, %v5984_v7, 0.0  ;;  %v1307_v49 = vsub.f32 %v5885_v63, %v1267_v16  ;;  %5260 = vpow2.f32 %v1352_v50  ;;  %v1270_v35 = vpop.xlane.xlu0 %1269 }
 0x322   : > { %v1308_v37 = vsub.f32 %v5855_v41, %v1270_v35 }
 0x323   : > { %v5989_v20 = vpop.eup %5252  ;;  %v1356_v27 = vmul.f32 1.442695, %v1307_v49 }
 0x324   : > { %v1415_v24 = vsel %vm1201_vm6, %v5989_v20, 0.0  ;;  %v5994_v25 = vpop.eup %5254  ;;  %v1273_v58 = vpop.xlane.xlu1 %1272  ;;  %v1358_v46 = vmul.f32 1.442695, %v1308_v37 }
 0x325   : > { %1407 = vadd.xlane.f32.xlu1 %v1406_v18  ;;  %v1412_v29 = vsel %vm1201_vm6, %v5994_v25, 0.0  ;;  %5262 = vpow2.f32 %v1356_v27  ;;  %v1309_v63 = vsub.f32 %v5894_v5, %v1273_v58  ;;  %v1276_v40 = vpop.xlane.xlu0 %1275 }
 0x326   : > { %5264 = vpow2.f32 %v1354_v2 }
 0x327   : > { %v5999_v34 = vpop.eup %5256  ;;  %v1360_v19 = vmul.f32 1.442695, %v1309_v63 }
 0x328   : > { %v1421_v31 = vsel %vm1201_vm6, %v5999_v34, 0.0  ;;  %v6005_v36 = vpop.eup %5258  ;;  %v1279_v5 = vpop.xlane.xlu1 %1278 }
 0x329   : > { %1416 = vadd.xlane.f32.xlu1 %v1415_v24  ;;  %v1418_v21 = vsel %vm1201_vm6, %v6005_v36, 0.0  ;;  %5266 = vpow2.f32 %v1360_v19  ;;  %v1282_v41 = vpop.xlane.xlu0 %1281  ;;  %v1311_v51 = vsub.f32 %v5901_v8, %v1279_v5 }
 0x32a   : > { %5268 = vpow2.f32 %v1358_v46  ;;  %v1312_v59 = vsub.f32 %v5883_v62, %v1282_v41 }
 0x32b   : > { %v6010_v11 = vpop.eup %5260  ;;  %v1364_v13 = vmul.f32 1.442695, %v1311_v51 }
 0x32c   : > { %v1427_v22 = vsel %vm1201_vm6, %v6010_v11, 0.0  ;;  %v1285_v32 = vpop.xlane.xlu1 %1284  ;;  %v1366_v60 = vmul.f32 1.442695, %v1312_v59 }
 0x32d   : > { %1413 = vadd.xlane.f32.xlu1 %v1412_v29  ;;  %v1313_v1 = vsub.f32 %v5908_v15, %v1285_v32 }
 0x32f   : > { %5092 = vrot.lane.b32.xlu0 %v5576_v17, %s5384_s9  ;;  %v1310_v17 = vsub.f32 %v5869_v52, %v1276_v40  ;;  %v6016_v28 = vpop.eup %5262  ;;  %v1368_v62 = vmul.f32 1.442695, %v1313_v1 }
 0x330   : > { %v1433_v52 = vsel %vm1201_vm6, %v6016_v28, 0.0  ;;  %v6022_v38 = vpop.eup %5264 }
 0x331   : > { %1422 = vadd.xlane.f32.xlu1 %v1421_v31  ;;  %v1362_v33 = vmul.f32 1.442695, %v1310_v17  ;;  %v1430_v0 = vsel %vm1201_vm6, %v6022_v38, 0.0 }
 0x333   : > { %5270 = vpow2.f32 %v1362_v33  ;;  %v6027_v8 = vpop.eup %5266 }
 0x334   : > { %5272 = vpow2.f32 %v1350_v54  ;;  %v1439_v4 = vsel %vm1201_vm6, %v6027_v8, 0.0  ;;  %v6031_v6 = vpop.eup %5268 }
 0x335   : > { %1419 = vadd.xlane.f32.xlu1 %v1418_v21  ;;  %5274 = vpow2.f32 %v1364_v13  ;;  %v1436_v15 = vsel %vm1201_vm6, %v6031_v6, 0.0 }
 0x336   : > { %5276 = vpow2.f32 %v1366_v60 }
 0x337   : > { %5278 = vpow2.f32 %v1368_v62 }
 0x339   : > { %1428 = vadd.xlane.f32.xlu1 %v1427_v22 }
 0x33d   : > { %1434 = vadd.xlane.f32.xlu1 %v1433_v52  ;;  %v6035_v43 = vpop.eup %5270 }
 0x33e   : > { %v6037_v12 = vpop.eup %5272  ;;  %v1442_v42 = vsel %vm1201_vm6, %v6035_v43, 0.0 }
 0x33f   : > { %v6041_v16 = vpop.eup %5274  ;;  %v1424_v18 = vsel %vm1201_vm6, %v6037_v12, 0.0 }
 0x340   : > { %v6045_v10 = vpop.eup %5276  ;;  %v1445_v50 = vsel %vm1201_vm6, %v6041_v16, 0.0 }
 0x341   : > { %1431 = vadd.xlane.f32.xlu1 %v1430_v0  ;;  %v6049_v49 = vpop.eup %5278  ;;  %v1448_v24 = vsel %vm1201_vm6, %v6045_v10, 0.0 }
 0x342   : > { %v1451_v53 = vsel %vm1201_vm6, %v6049_v49, 0.0 }
 0x345   : > { %1440 = vadd.xlane.f32.xlu1 %v1439_v4 }
 0x349   : > { %1437 = vadd.xlane.f32.xlu1 %v1436_v15 }
 0x34d   : > { %1443 = vadd.xlane.f32.xlu1 %v1442_v42 }
 0x34e   : > { %1425 = vadd.xlane.f32.xlu0 %v1424_v18 }
 0x351   : > { %1446 = vadd.xlane.f32.xlu1 %v1445_v50 }
 0x352   : > { %1449 = vadd.xlane.f32.xlu0 %v1448_v24 }
 0x355   : > { %1452 = vadd.xlane.f32.xlu1 %v1451_v53 }
 0x386   : > { %v1375_v35 = vpop.xlane.xlu1 %1374 }
 0x387   : > { %v1372_v27 = vpop.xlane.xlu0 %1371 }
 0x388   : > { %5280 = vrcp.f32 %v1372_v27 }
 0x389   : > { %5282 = vrcp.f32 %v1375_v35 }
 0x38a   : > { %v1381_v63 = vpop.xlane.xlu1 %1380 }
 0x38e   : > { %v1378_v2 = vpop.xlane.xlu0 %1377 }
 0x38f   : > { %5284 = vrcp.f32 %v1378_v2 }
 0x390   : > { %5286 = vrcp.f32 %v1381_v63 }
 0x392   : > { %v5281_v58 = vpop.eup %5280  ;;  %v1387_v37 = vpop.xlane.xlu1 %1386 }
 0x393   : > { %v1482_v29 = vmul.f32 %v5281_v58, %v5921_v45  ;;  %v5283_v33 = vpop.eup %5282 }
 0x394   : > { %v1483_v59 = vmul.f32 %v5283_v33, %v5919_v44 }
 0x395   : > { %4970 = vmatprep.mubr.msk.f32.mxu0 %vm1201_vm6, %v1482_v29 }
 0x396   : > { %v1384_v31 = vpop.xlane.xlu0 %1383 }
 0x397   : > { %5288 = vrcp.f32 %v1384_v31 }
 0x398   : > { %5290 = vrcp.f32 %v1387_v37 }
 0x399   : > { %v5285_v54 = vpop.eup %5284 }
 0x39a   : > { %v1393_v19 = vpop.xlane.xlu1 %1392  ;;  %v5287_v32 = vpop.eup %5286  ;;  %v1484_v13 = vmul.f32 %v5285_v54, %v5933_v56 }
 0x39b   : > { %v1485_v60 = vmul.f32 %v5287_v32, %v5928_v48 }
 0x39e   : > { %v1390_v40 = vpop.xlane.xlu0 %1389 }
 0x39f   : > { %5292 = vrcp.f32 %v1390_v40 }
 0x3a0   : > { %5294 = vrcp.f32 %v1393_v19 }
 0x3a1   : > { %v5289_v1 = vpop.eup %5288 }
 0x3a2   : > { %v1396_v21 = vpop.xlane.xlu0 %1395  ;;  %v5291_v0 = vpop.eup %5290  ;;  %v1486_v4 = vmul.f32 %v5289_v1, %v5944_v14 }
 0x3a3   : > { %5296 = vrcp.f32 %v1396_v21  ;;  %v1487_v44 = vmul.f32 %v5291_v0, %v5938_v3 }
 0x3a6   : > { %v1399_v5 = vpop.xlane.xlu1 %1398  ;;  %v1402_v46 = vpop.xlane.xlu0 %1401 }
 0x3a7   : > { %5298 = vrcp.f32 %v1399_v5 }
 0x3a8   : > { %5300 = vrcp.f32 %v1402_v46 }
 0x3a9   : > { %v5293_v15 = vpop.eup %5292 }
 0x3aa   : > { %v1405_v17 = vpop.xlane.xlu1 %1404  ;;  %v5093_v57 = vpop.permute.xlu0 %5092  ;;  %v1488_v18 = vmul.f32 %v5293_v15, %v5954_v30 }
 0x3ab   : > { %v5095_v22 = vunpack.i.h.bf16 %v5093_v57  ;;  %v5094_v45 = vunpack.i.l.bf16 %v5093_v57  ;;  %5302 = vrcp.f32 %v1405_v17  ;;  %v5295_v56 = vpop.eup %5294 }
 0x3ac   : > { %v1489_v48 = vmul.f32 %v5295_v56, %v5949_v23  ;;  %v1890_v56 = vld [vmem:[%s5501_s21 + $0x18] sm:$0xf] }
 0x3ad   : > { %v5050_v41 = vpack.c.bf16 %v5095_v22, %v5094_v45  ;;  %v5297_v50 = vpop.eup %5296 }
 0x3ae   : > { %v1411_v51 = vpop.xlane.xlu1 %1410  ;;  %v1490_v53 = vmul.f32 %v5297_v50, %v5960_v39  ;;  %v5345_v50 = vld [vmem:[%s6634_s28] sm:$0xff] }
 0x3af   : > { %5051 = vmatprep.subr.bf16.mxu0 %v5050_v41 }
 0x3b0   : > { %5053 = vmatpush3.bf16.msra.mxu0 %v5050_v41 }
 0x3b1   : > { %v5299_v14 = vpop.eup %5298 }
 0x3b2   : > { %v1408_v52 = vpop.xlane.xlu1 %1407  ;;  %v5301_v27 = vpop.eup %5300  ;;  %v1491_v3 = vmul.f32 %v5299_v14, %v5967_v47 }
 0x3b3   : > { %4971 = vmatmul.mubr.msk.f32.vlgmr.msra.gmra.mrb[2].mxu0 %vm1201_vm6, %v1483_v59  ;;  %5304 = vrcp.f32 %v1408_v52  ;;  %v1492_v29 = vmul.f32 %v5301_v27, %v5964_v26 }
 0x3b4   : > { %4973 = vmatprep.mubr.msk.f32.mxu0 %vm1201_vm6, %v1484_v13  ;;  %5306 = vrcp.f32 %v1411_v51 }
 0x3b5   : > { %v5303_v30 = vpop.eup %5302 }
 0x3b6   : > { %v1417_v62 = vpop.xlane.xlu1 %1416  ;;  %v1493_v23 = vmul.f32 %v5303_v30, %v5974_v55 }
 0x3b7   : > { %4974 = vmatmul.mubr.msk.f32.gmra.mrb[4].mxu0 %vm1201_vm6, %v1485_v60 }
 0x3b8   : > { %4976 = vmatprep.mubr.msk.f32.mxu0 %vm1201_vm6, %v1486_v4  ;;  %v1888_v4 = vld [vmem:[%s5501_s21 + $0x8] sm:$0xff] }
 0x3ba   : > { %v1414_v42 = vpop.xlane.xlu1 %1413 }
 0x3bb   : > { %4977 = vmatmul.mubr.msk.f32.gmra.mrb[6].mxu0 %vm1201_vm6, %v1487_v44  ;;  %5308 = vrcp.f32 %v1414_v42  ;;  %v1889_v44 = vld [vmem:[%s5501_s21 + $0x10] sm:$0xff] }
 0x3bc   : > { %4979 = vmatprep.mubr.msk.f32.mxu0 %vm1201_vm6, %v1488_v18  ;;  %5310 = vrcp.f32 %v1417_v62  ;;  %v5058_v42 = vpack.c.bf16 %v1890_v56, %v1889_v44 }
 0x3bd   : > { %v5305_v35 = vpop.eup %5304 }
 0x3be   : > { %v1423_v24 = vpop.xlane.xlu1 %1422  ;;  %v5307_v39 = vpop.eup %5306  ;;  %v1494_v63 = vmul.f32 %v5305_v35, %v5984_v7 }
 0x3bf   : > { %4980 = vmatmul.mubr.msk.f32.gmra.mrb[8].mxu0 %vm1201_vm6, %v1489_v48  ;;  %v1495_v26 = vmul.f32 %v5307_v39, %v5979_v61 }
 0x3c0   : > { %4982 = vmatprep.mubr.msk.f32.mxu0 %vm1201_vm6, %v1490_v53 }
 0x3c2   : > { %v1420_v58 = vpop.xlane.xlu1 %1419 }
 0x3c3   : > { %5312 = vrcp.f32 %v1420_v58  ;;  %4983 = vmatmul.mubr.msk.f32.gmra.mrb[10].mxu0 %vm1201_vm6, %v1491_v3  ;;  %v5347_v3 = vld [vmem:[%s6634_s28 + $0x10] sm:$0xff] }
 0x3c4   : > { %5314 = vrcp.f32 %v1423_v24  ;;  %4985 = vmatprep.mubr.msk.f32.mxu0 %vm1201_vm6, %v1492_v29  ;;  %v5346_v24 = vld [vmem:[%s6634_s28 + $0x18] sm:$0xff] }
 0x3c5   : > { %v5309_v31 = vpop.eup %5308 }
 0x3c6   : > { %v1429_v2 = vpop.xlane.xlu1 %1428  ;;  %v5311_v47 = vpop.eup %5310  ;;  %v1496_v40 = vmul.f32 %v5309_v31, %v5994_v25  ;;  %v5348_v31 = vld [vmem:[%s6634_s28 + $0x28] sm:$0xff] }
 0x3c7   : > { %4986 = vmatmul.mubr.msk.f32.gmra.mrb[12].mxu0 %vm1201_vm6, %v1493_v23  ;;  %v1497_v19 = vmul.f32 %v5311_v47, %v5989_v20  ;;  %5316 = vrcp.f32 %v1429_v2 }
 0x3c8   : > { %4988 = vmatprep.mubr.msk.f32.mxu0 %vm1201_vm6, %v1494_v63 }
 0x3ca   : > { %v1435_v37 = vpop.xlane.xlu1 %1434 }
 0x3cb   : > { %4989 = vmatmul.mubr.msk.f32.gmra.mrb[14].mxu0 %vm1201_vm6, %v1495_v26 }
 0x3cc   : > { %4991 = vmatprep.mubr.msk.f32.mxu0 %vm1201_vm6, %v1496_v40 }
 0x3cd   : > { %v5313_v55 = vpop.eup %5312 }
 0x3ce   : > { %v5315_v21 = vpop.eup %5314  ;;  %v1432_v7 = vpop.xlane.xlu1 %1431  ;;  %v1498_v5 = vmul.f32 %v5313_v55, %v6005_v36 }
 0x3cf   : > { %4992 = vmatmul.mubr.msk.f32.gmra.mrb[16].mxu0 %vm1201_vm6, %v1497_v19  ;;  %v1499_v61 = vmul.f32 %v5315_v21, %v5999_v34  ;;  %5318 = vrcp.f32 %v1432_v7 }
 0x3d0   : > { %4994 = vmatprep.mubr.msk.f32.mxu0 %vm1201_vm6, %v1498_v5 }
 0x3d1   : > { %v5317_v36 = vpop.eup %5316 }
 0x3d2   : > { %v1441_v46 = vpop.xlane.xlu1 %1440  ;;  %v1501_v51 = vmul.f32 %v5317_v36, %v6010_v11 }
 0x3d3   : > { %4995 = vmatmul.mubr.msk.f32.gmra.mrb[18].mxu0 %vm1201_vm6, %v1499_v61  ;;  %v5350_v61 = vld [vmem:[%s6634_s28 + $0x38] sm:$0xff] }
 0x3d6   : > { %v1438_v25 = vpop.xlane.xlu1 %1437 }
 0x3d9   : > { %v5319_v22 = vpop.eup %5318 }
 0x3da   : > { %v1444_v57 = vpop.xlane.xlu1 %1443  ;;  %v1502_v59 = vmul.f32 %v5319_v22, %v6022_v38 }
 0x3db   : > { %v1426_v17 = vpop.xlane.xlu0 %1425 }
 0x3dc   : > { %5320 = vrcp.f32 %v1426_v17  ;;  %v5351_v17 = vld [vmem:[%s6634_s28 + $0x30] sm:$0xff] }
 0x3dd   : > { %5322 = vrcp.f32 %v1435_v37  ;;  %v5349_v37 = vld [vmem:[%s6634_s28 + $0x20] sm:$0xff] }
 0x3de   : > { %5324 = vrcp.f32 %v1438_v25  ;;  %v1447_v20 = vpop.xlane.xlu1 %1446 }
 0x3df   : > { %5326 = vrcp.f32 %v1441_v46  ;;  %v1450_v45 = vpop.xlane.xlu0 %1449 }
 0x3e0   : > { %5328 = vrcp.f32 %v1444_v57 }
 0x3e1   : > { %5330 = vrcp.f32 %v1447_v20 }
 0x3e2   : > { %5332 = vrcp.f32 %v1450_v45  ;;  %v1453_v33 = vpop.xlane.xlu1 %1452 }
 0x3e3   : > { %5334 = vrcp.f32 %v1453_v33 }
 0x3e6   : > { %v5321_v41 = vpop.eup %5320 }
 0x3e7   : > { %v1500_v34 = vmul.f32 %v5321_v41, %v6037_v12  ;;  %v5323_v54 = vpop.eup %5322 }
 0x3e8   : > { %v5325_v32 = vpop.eup %5324  ;;  %v1503_v52 = vmul.f32 %v5323_v54, %v6016_v28  ;;  %v5353_v54 = vld [vmem:[%s6634_s28 + $0x40] sm:$0xff] }
 0x3e9   : > { %4997 = vmatprep.mubr.msk.f32.mxu0 %vm1201_vm6, %v1500_v34  ;;  %v5327_v13 = vpop.eup %5326  ;;  %v1504_v12 = vmul.f32 %v5325_v32, %v6031_v6  ;;  %v5352_v34 = vld [vmem:[%s6634_s28 + $0x48] sm:$0xff] }
 0x3ea   : > { %4998 = vmatmul.mubr.msk.f32.gmra.mrb[20].mxu0 %vm1201_vm6, %v1501_v51  ;;  %v5329_v1 = vpop.eup %5328  ;;  %v1505_v11 = vmul.f32 %v5327_v13, %v6027_v8 }
 0x3eb   : > { %5000 = vmatprep.mubr.msk.f32.mxu0 %vm1201_vm6, %v1502_v59  ;;  %v5331_v38 = vpop.eup %5330  ;;  %v1506_v60 = vmul.f32 %v5329_v1, %v6035_v43  ;;  %v1887_v43 = vld [vmem:[%s5501_s21] sm:$0xff] }
 0x3ec   : > { %v5333_v0 = vpop.eup %5332  ;;  %v1507_v28 = vmul.f32 %v5331_v38, %v6041_v16  ;;  %v5054_v15 = vpack.c.bf16 %v1888_v4, %v1887_v43 }
 0x3ed   : > { %v5335_v6 = vpop.eup %5334  ;;  %v1508_v62 = vmul.f32 %v5333_v0, %v6045_v10  ;;  %v5355_v0 = vld [vmem:[%s6634_s28 + $0x50] sm:$0xff] }
 0x3ee   : > { %5001 = vmatmul.mubr.msk.f32.gmra.mrb[22].mxu0 %vm1201_vm6, %v1503_v52  ;;  %v1509_v8 = vmul.f32 %v5335_v6, %v6049_v49  ;;  %5055 = vmatprep.subr.bf16.mxu1 %v5054_v15  ;;  %v5344_v49 = vld [vmem:[%s6634_s28 + $0x8] sm:$0xff] }
 0x3ef   : > { %5003 = vmatprep.mubr.msk.f32.mxu0 %vm1201_vm6, %v1504_v12  ;;  %5057 = vmatpush3.bf16.msra.mxu1 %v5054_v15  ;;  %v5356_v15 = vld [vmem:[%s6634_s28 + $0x68] sm:$0xff] }
 0x3f0   : > { %5060 = vmatprep.subr.msk.bf16.mxu1 %vm5552_vm4, %v5058_v42 }
 0x3f2   : > { %5004 = vmatmul.mubr.msk.f32.gmra.mrb[24].mxu0 %vm1201_vm6, %v1505_v11  ;;  %v5354_v11 = vld [vmem:[%s6634_s28 + $0x58] sm:$0xff] }
 0x3f3   : > { %5006 = vmatprep.mubr.msk.f32.mxu0 %vm1201_vm6, %v1506_v60  ;;  %5063 = vmatpush3.bf16.msk.msra.mxu1 %vm5552_vm4, %v5058_v42  ;;  %v5357_v42 = vld [vmem:[%s6634_s28 + $0x60] sm:$0xff] }
 0x3f6   : > { %5007 = vmatmul.mubr.msk.f32.gmra.mrb[26].mxu0 %vm1201_vm6, %v1507_v28 }
 0x3f7   : > { %5009 = vmatprep.mubr.msk.f32.mxu0 %vm1201_vm6, %v1508_v62 }
 0x3fa   : > { %5010 = vmatmul.mubr.msk.f32.gmra.mrb[28].mxu0 %vm1201_vm6, %v1509_v8 }
 0x486   : > { %v4972_v16 = vpop.f32.mrb[2].mxu0 }
 0x487   : > { %v1666_v10 = vpop.f32.mrb[3].mxu0  ;;  %v1806_v18 = vmul.f32 %v5344_v49, %v4972_v16 }
 0x488   : > { %v1805_v48 = vmul.f32 %v5345_v50, %v1666_v10 }
 0x489   : > { %v1860_v58 = vsel %vm788_vm2, %v1806_v18, 0.0 }
 0x48a   : > { %v4975_v14 = vpop.f32.mrb[4].mxu0  ;;  %v1833_v35 = vsel %vm788_vm2, %v1805_v48, 0.0 }
 0x48b   : > { %v1808_v53 = vmul.f32 %v5346_v24, %v4975_v14  ;;  %v1676_v27 = vpop.f32.mrb[5].mxu0  ;;  %v5358_v14 = vld [vmem:[%s6634_s28 + $0x78] sm:$0xff] }
 0x48c   : > { %v1807_v30 = vmul.f32 %v5347_v3, %v1676_v27  ;;  %v5359_v27 = vld [vmem:[%s6634_s28 + $0x70] sm:$0xff] }
 0x48d   : > { %v1861_v29 = vsel %vm788_vm2, %v1808_v53, 0.0 }
 0x48e   : > { %v1862_v23 = vadd.f32 %v1861_v29, %v1860_v58  ;;  %v1834_v39 = vsel %vm788_vm2, %v1807_v30, 0.0  ;;  %v4978_v2 = vpop.f32.mrb[6].mxu0 }
 0x48f   : > { %v1835_v63 = vadd.f32 %v1834_v39, %v1833_v35  ;;  %v1810_v26 = vmul.f32 %v5348_v31, %v4978_v2  ;;  %v1686_v47 = vpop.f32.mrb[7].mxu0  ;;  %v5360_v39 = vld [vmem:[%s6634_s28 + $0x88] sm:$0xff]  ;;  %v5361_v31 = vld [vmem:[%s6634_s28 + $0x80] sm:$0xff] }
 0x490   : > { %v1809_v40 = vmul.f32 %v5349_v37, %v1686_v47 }
 0x491   : > { %v1863_v55 = vsel %vm788_vm2, %v1810_v26, 0.0 }
 0x492   : > { %v1864_v19 = vadd.f32 %v1863_v55, %v1862_v23  ;;  %v1836_v21 = vsel %vm788_vm2, %v1809_v40, 0.0  ;;  %v4981_v7 = vpop.f32.mrb[8].mxu0 }
 0x493   : > { %v1837_v5 = vadd.f32 %v1836_v21, %v1835_v63  ;;  %v1812_v46 = vmul.f32 %v5350_v61, %v4981_v7  ;;  %v1696_v25 = vpop.f32.mrb[9].mxu0  ;;  %v5362_v21 = vld [vmem:[%s6634_s28 + $0x98] sm:$0xff]  ;;  %v5363_v61 = vld [vmem:[%s6634_s28 + $0x90] sm:$0xff] }
 0x494   : > { %v1811_v57 = vmul.f32 %v5351_v17, %v1696_v25 }
 0x495   : > { %v1865_v20 = vsel %vm788_vm2, %v1812_v46, 0.0 }
 0x496   : > { %v1866_v36 = vadd.f32 %v1865_v20, %v1864_v19  ;;  %v1838_v22 = vsel %vm788_vm2, %v1811_v57, 0.0  ;;  %v4984_v45 = vpop.f32.mrb[10].mxu0 }
 0x497   : > { %v1839_v41 = vadd.f32 %v1838_v22, %v1837_v5  ;;  %v1814_v33 = vmul.f32 %v5352_v34, %v4984_v45  ;;  %v1706_v51 = vpop.f32.mrb[11].mxu0  ;;  %v5364_v22 = vld [vmem:[%s6634_s28 + $0xa8] sm:$0xff]  ;;  %v5365_v34 = vld [vmem:[%s6634_s28 + $0xa0] sm:$0xff] }
 0x498   : > { %v1813_v59 = vmul.f32 %v5353_v54, %v1706_v51 }
 0x499   : > { %v1867_v32 = vsel %vm788_vm2, %v1814_v33, 0.0 }
 0x49a   : > { %v1868_v52 = vadd.f32 %v1867_v32, %v1866_v36  ;;  %v1840_v13 = vsel %vm788_vm2, %v1813_v59, 0.0  ;;  %v4987_v12 = vpop.f32.mrb[12].mxu0 }
 0x49b   : > { %v1841_v1 = vadd.f32 %v1840_v13, %v1839_v41  ;;  %v1816_v38 = vmul.f32 %v5354_v11, %v4987_v12  ;;  %v1716_v60 = vpop.f32.mrb[13].mxu0  ;;  %v5366_v13 = vld [vmem:[%s6634_s28 + $0xb8] sm:$0xff]  ;;  %v5367_v11 = vld [vmem:[%s6634_s28 + $0xb0] sm:$0xff] }
 0x49c   : > { %v1815_v28 = vmul.f32 %v5355_v0, %v1716_v60 }
 0x49d   : > { %v1869_v6 = vsel %vm788_vm2, %v1816_v38, 0.0 }
 0x49e   : > { %v1870_v62 = vadd.f32 %v1869_v6, %v1868_v52  ;;  %v1842_v8 = vsel %vm788_vm2, %v1815_v28, 0.0  ;;  %v4990_v43 = vpop.f32.mrb[14].mxu0 }
 0x49f   : > { %v1843_v4 = vadd.f32 %v1842_v8, %v1841_v1  ;;  %v1818_v44 = vmul.f32 %v5356_v15, %v4990_v43  ;;  %v1726_v56 = vpop.f32.mrb[15].mxu0  ;;  %v5368_v8 = vld [vmem:[%s6634_s28 + $0xc8] sm:$0xff]  ;;  %v5369_v15 = vld [vmem:[%s6634_s28 + $0xc0] sm:$0xff] }
 0x4a0   : > { %v1817_v16 = vmul.f32 %v5357_v42, %v1726_v56 }
 0x4a1   : > { %v1871_v10 = vsel %vm788_vm2, %v1818_v44, 0.0 }
 0x4a2   : > { %v1872_v49 = vadd.f32 %v1871_v10, %v1870_v62  ;;  %v1844_v18 = vsel %vm788_vm2, %v1817_v16, 0.0  ;;  %v4993_v50 = vpop.f32.mrb[16].mxu0 }
 0x4a3   : > { %v1845_v48 = vadd.f32 %v1844_v18, %v1843_v4  ;;  %v1820_v24 = vmul.f32 %v5358_v14, %v4993_v50  ;;  %v1736_v53 = vpop.f32.mrb[17].mxu0  ;;  %v5370_v18 = vld [vmem:[%s6634_s28 + $0xd8] sm:$0xff]  ;;  %v5371_v14 = vld [vmem:[%s6634_s28 + $0xd0] sm:$0xff] }
 0x4a4   : > { %v1819_v3 = vmul.f32 %v5359_v27, %v1736_v53 }
 0x4a5   : > { %v1873_v30 = vsel %vm788_vm2, %v1820_v24, 0.0 }
 0x4a6   : > { %v1874_v58 = vadd.f32 %v1873_v30, %v1872_v49  ;;  %v1846_v29 = vsel %vm788_vm2, %v1819_v3, 0.0  ;;  %v4996_v35 = vpop.f32.mrb[18].mxu0 }
 0x4a7   : > { %v1847_v23 = vadd.f32 %v1846_v29, %v1845_v48  ;;  %v1822_v2 = vmul.f32 %v5360_v39, %v4996_v35  ;;  %v1746_v63 = vpop.f32.mrb[19].mxu0 }
 0x4a8   : > { %v1821_v26 = vmul.f32 %v5361_v31, %v1746_v63  ;;  %v5373_v31 = vld [vmem:[#allocation2] sm:$0xff] }
 0x4a9   : > { %v1875_v47 = vsel %vm788_vm2, %v1822_v2, 0.0  ;;  %v5372_v2 = vld [vmem:[#allocation2 + $0x8] sm:$0xff] }
 0x4aa   : > { %v1876_v37 = vadd.f32 %v1875_v47, %v1874_v58  ;;  %v1848_v40 = vsel %vm788_vm2, %v1821_v26, 0.0  ;;  %v4459_v58 = vld [vmem:[%s6636_s30] ss:$0 sm:$0xff] }
 0x4ab   : > { %v1849_v55 = vadd.f32 %v1848_v40, %v1847_v23  ;;  %v2030_v40 = vld [vmem:[%s5519_s3] sm:$0xff] }
 0x4bd   : > { %v4999_v19 = vpop.f32.mrb[20].mxu0 }
 0x4be   : > { %v1824_v7 = vmul.f32 %v5362_v21, %v4999_v19  ;;  %v1756_v5 = vpop.f32.mrb[21].mxu0  ;;  %v2046_v19 = vld [vmem:[%s5519_s3 + $0x80] sm:$0xff] }
 0x4bf   : > { %v1823_v46 = vmul.f32 %v5363_v61, %v1756_v5  ;;  %v2054_v5 = vld [vmem:[%s5519_s3 + $0xc0] sm:$0x33] }
 0x4c0   : > { %v1877_v25 = vsel %vm788_vm2, %v1824_v7, 0.0  ;;  %v4482_v61 = vcombine.high %v2046_v19, %v2054_v5 }
 0x4c1   : > { %v1878_v17 = vadd.f32 %v1877_v25, %v1876_v37  ;;  %v1850_v57 = vsel %vm788_vm2, %v1823_v46, 0.0  ;;  %v5002_v20 = vpop.f32.mrb[22].mxu0  ;;  %v4481_v46 = vcombine.low %v2046_v19, %v2054_v5  ;;  %v2043_v19 = vld [vmem:[%s5519_s3 + $0x68] sm:$0xff] }
 0x4c2   : > { %v1851_v36 = vadd.f32 %v1850_v57, %v1849_v55  ;;  %v1826_v45 = vmul.f32 %v5364_v22, %v5002_v20  ;;  %v1766_v41 = vpop.f32.mrb[23].mxu0  ;;  %v2038_v55 = vld [vmem:[%s5519_s3 + $0x40] sm:$0xff] }
 0x4c3   : > { %v1825_v33 = vmul.f32 %v5365_v34, %v1766_v41  ;;  %v4465_v21 = vcombine.low %v2030_v40, %v2038_v55  ;;  %v4466_v7 = vcombine.high %v2030_v40, %v2038_v55  ;;  %v2295_v25 = vsel %vm2293_vm7, %v4481_v46, 0  ;;  %v2042_v40 = vld [vmem:[%s5519_s3 + $0x60] sm:$0xff]  ;;  %v2035_v55 = vld [vmem:[%s5519_s3 + $0x28] sm:$0xff] }
 0x4c4   : > { %v1879_v51 = vsel %vm788_vm2, %v1826_v45, 0.0  ;;  %v2050_v46 = vld [vmem:[%s5519_s3 + $0xa0] sm:$0xff] }
 0x4c5   : > { %v1880_v54 = vadd.f32 %v1879_v51, %v1878_v17  ;;  %v1852_v59 = vsel %vm788_vm2, %v1825_v33, 0.0  ;;  %v5005_v32 = vpop.f32.mrb[24].mxu0  ;;  %2342 = vmatprep.subr.bf16.mxu0 %v4466_v7 }
 0x4c6   : > { %v1853_v52 = vadd.f32 %v1852_v59, %v1851_v36  ;;  %v1828_v12 = vmul.f32 %v5366_v13, %v5005_v32  ;;  %v1776_v1 = vpop.f32.mrb[25].mxu0  ;;  %2343 = vmatpush1.bf16.msra.mxu0 %v4465_v21  ;;  %v2039_v59 = vld [vmem:[%s5519_s3 + $0x48] sm:$0xff] }
 0x4c7   : > { %v1827_v38 = vmul.f32 %v5367_v11, %v1776_v1  ;;  %4497 = vmatprep.subr.msk.bf16.mxu0 %vm2293_vm7, %v4482_v61  ;;  %v2047_v13 = vld [vmem:[%s5519_s3 + $0x88] sm:$0xff]  ;;  %v4476_v61 = vcombine.high %v2035_v55, %v2043_v19 }
 0x4c8   : > { %v1881_v60 = vsel %vm788_vm2, %v1828_v12, 0.0  ;;  %v2055_v12 = vld [vmem:[%s5519_s3 + $0xc8] sm:$0x33] }
 0x4c9   : > { %v1882_v0 = vadd.f32 %v1881_v60, %v1880_v54  ;;  %v1854_v28 = vsel %vm788_vm2, %v1827_v38, 0.0  ;;  %v5008_v6 = vpop.f32.mrb[26].mxu0  ;;  %v2031_v54 = vld [vmem:[%s5519_s3 + $0x8] sm:$0xff]  ;;  %v4484_v1 = vcombine.high %v2047_v13, %v2055_v12  ;;  %v4483_v11 = vcombine.low %v2047_v13, %v2055_v12  ;;  %v2032_v60 = vld [vmem:[%s5519_s3 + $0x10] sm:$0xff] }
 0x4ca   : > { %v1855_v62 = vadd.f32 %v1854_v28, %v1853_v52  ;;  %v1830_v43 = vmul.f32 %v5368_v8, %v5008_v6  ;;  %v1786_v4 = vpop.f32.mrb[27].mxu0  ;;  %2345 = vmatpush1.bf16.msra.mxu0 %v2295_v25  ;;  %v4468_v32 = vcombine.high %v2031_v54, %v2039_v59  ;;  %v4467_v52 = vcombine.low %v2031_v54, %v2039_v59  ;;  %v2033_v28 = vld [vmem:[%s5519_s3 + $0x18] sm:$0xff]  ;;  %v2058_v25 = vld [vmem:[%s5519_s3 + $0xe0] sm:$0x33] }
 0x4cb   : > { %v1829_v44 = vmul.f32 %v5369_v15, %v1786_v4  ;;  %v5385_v38 = vmov 0   ;;  %v2301_v6 = vsel %vm2293_vm7, %v4483_v11, 0  ;;  %v2037_v54 = vld [vmem:[%s5519_s3 + $0x38] sm:$0xff]  ;;  %v2060_v11 = vld [vmem:[%s5519_s3 + $0xf0] sm:$0x33] }
 0x4cc   : > { %v1883_v56 = vsel %vm788_vm2, %v1830_v43, 0.0  ;;  %2385 = vmatprep.subr.bf16.mxu1 %v4468_v32  ;;  %2374 = vmatprep.mubr.bf16.mxu0 %v5385_v38  ;;  %v2041_v43 = vld [vmem:[%s5519_s3 + $0x58] sm:$0xff] }
 0x4cd   : > { %v1884_v42 = vadd.f32 %v1883_v56, %v1882_v0  ;;  %v1856_v16 = vsel %vm788_vm2, %v1829_v44, 0.0  ;;  %v5011_v10 = vpop.f32.mrb[28].mxu0  ;;  %v2040_v0 = vld [vmem:[%s5519_s3 + $0x50] sm:$0xff]  ;;  %v4471_v4 = vcombine.low %v2033_v28, %v2041_v43  ;;  %v4472_v15 = vcombine.high %v2033_v28, %v2041_v43  ;;  %v2045_v59 = vld [vmem:[%s5519_s3 + $0x78] sm:$0xff] }
 0x4ce   : > { %v1857_v49 = vadd.f32 %v1856_v16, %v1855_v62  ;;  %v1832_v50 = vmul.f32 %v5370_v18, %v5011_v10  ;;  %v1796_v48 = vpop.f32.mrb[29].mxu0  ;;  %v4469_v62 = vcombine.low %v2032_v60, %v2040_v0  ;;  %v4470_v8 = vcombine.high %v2032_v60, %v2040_v0  ;;  %v2053_v60 = vld [vmem:[%s5519_s3 + $0xb8] sm:$0xff] }
 0x4cf   : > { %v1831_v24 = vmul.f32 %v5371_v14, %v1796_v48  ;;  %v4480_v12 = vcombine.high %v2037_v54, %v2045_v59  ;;  %v2061_v0 = vld [vmem:[%s5519_s3 + $0xf8] sm:$0x33] }
 0x4d0   : > { %v1885_v53 = vsel %vm788_vm2, %v1832_v50, 0.0  ;;  %2428 = vmatprep.subr.bf16.mxu0 %v4470_v8  ;;  %v4463_v50 = vld [vmem:[%s6637_s20] ss:$0 sm:$0xff]  ;;  %v4496_v8 = vcombine.high %v2053_v60, %v2061_v0 }
 0x4d1   : > { %v1886_v27 = vadd.f32 %v1885_v53, %v1884_v42  ;;  %v1858_v3 = vsel %vm788_vm2, %v1831_v24, 0.0  ;;  %v4464_v24 = vld [vmem:[%s6638_s5] ss:$0 sm:$0xff] }
 0x4d2   : > { %v1859_v30 = vadd.f32 %v1858_v3, %v1857_v49 }
 0x4d4   : > { %5020 = vmatprep.mubr.msk.f32.mxu1 %vm788_vm2, %v1859_v30  ;;  %v2048_v30 = vld [vmem:[%s5519_s3 + $0x90] sm:$0xff] }
 0x4d5   : > { %5021 = vmatmul.mubr.msk.f32.vlgmr.msra.gmra.mrb[28].mxu1 %vm788_vm2, %v1886_v27 }
 0x4d6   : > { %2386 = vmatpush1.bf16.msra.mxu1 %v4467_v52  ;;  %2417 = vmatprep.mubr.bf16.mxu1 %v5385_v38 }
 0x4d7   : > { %4499 = vmatprep.subr.msk.bf16.mxu1 %vm2293_vm7, %v4484_v1  ;;  %v2052_v1 = vld [vmem:[%s5519_s3 + $0xb0] sm:$0xff] }
 0x4d8   : > { %v4493_v43 = vcombine.low %v2052_v1, %v2060_v11 }
 0x4da   : > { %2388 = vmatpush1.bf16.msra.mxu1 %v2301_v6  ;;  %v4479_v6 = vcombine.low %v2037_v54, %v2045_v59 }
 0x4db   : > { %2471 = vmatprep.subr.bf16.mxu1 %v4472_v15  ;;  %v2331_v15 = vsel %vm2293_vm7, %v4493_v43, 0 }
 0x5a8   : > { %v5022_v29 = vpop.f32.mrb[28].mxu1 }
 0x5a9   : > { %v1979_v35 = vadd.f32 %v5022_v29, %v4459_v58  ;;  %v1973_v23 = vpop.f32.mrb[29].mxu1 }
 0x5aa   : > { %v1974_v39 = vadd.f32 %v4459_v58, %v1973_v23  ;;  %v2056_v58 = vld [vmem:[%s5519_s3 + $0xd0] sm:$0x33]  ;;  %v2057_v23 = vld [vmem:[%s5519_s3 + $0xd8] sm:$0x33] }
 0x5ab   : > { %v1983_v63 = vadd.f32 %v5372_v2, %v1979_v35  ;;  %v2049_v35 = vld [vmem:[%s5519_s3 + $0x98] sm:$0xff]  ;;  %v4486_v2 = vcombine.high %v2048_v30, %v2056_v58 }
 0x5ac   : > { %v1982_v26 = vadd.f32 %v5373_v31, %v1974_v39  ;;  %v4488_v31 = vcombine.high %v2049_v35, %v2057_v23 }
 0x5ad   : > { %v1989_v47 = vsel %vm788_vm2, %v1983_v63, 0.0 }
 0x5ae   : > { %1990 = vadd.xlane.f32.xlu1 %v1989_v47  ;;  %v1986_v37 = vsel %vm788_vm2, %v1982_v26, 0.0  ;;  %v4487_v47 = vcombine.low %v2049_v35, %v2057_v23  ;;  %v5112_v35 = vld [vmem:[%s5531_s17 + $0x60] sm:$0xff]  }
 0x5af   : > { %1987 = vadd.xlane.f32.xlu0 %v1986_v37  ;;  %v2034_v37 = vld [vmem:[%s5519_s3 + $0x20] sm:$0xff] }
 0x5b0   : > { %v2313_v7 = vsel %vm2293_vm7, %v4487_v47, 0  ;;  %v4474_v5 = vcombine.high %v2034_v37, %v2042_v40  ;;  %v5113_v23 = vld [vmem:[%s5531_s17 + $0xe0] sm:$0xff]   ;;  %v5118_v47 = vld [vmem:[%s5531_s17 + $0x28] sm:$0xff]  }
 0x63b   : > { %v1991_v17 = vpop.xlane.xlu1 %1990 }
 0x63c   : > { %v1994_v57 = vmul.f32 0.035714287, %v1991_v17  ;;  %v1988_v20 = vpop.xlane.xlu0 %1987  ;;  %v2051_v17 = vld [vmem:[%s5519_s3 + $0xa8] sm:$0xff] }
 0x63d   : > { %v1993_v36 = vmul.f32 0.035714287, %v1988_v20  ;;  %v4473_v20 = vcombine.low %v2034_v37, %v2042_v40  ;;  %v5119_v37 = vld [vmem:[%s5531_s17 + $0xa8] sm:$0xff]   ;;  %v5120_v40 = vld [vmem:[%s5531_s17 + $0x70] sm:$0xff]  }
 0x63e   : > { %v1996_v22 = vsub.f32 %v1983_v63, %v1994_v57  ;;  %v2059_v57 = vld [vmem:[%s5519_s3 + $0xe8] sm:$0x33] }
 0x63f   : > { %v1995_v45 = vsub.f32 %v1982_v26, %v1993_v36  ;;  %v4485_v26 = vcombine.low %v2048_v30, %v2056_v58  ;;  %v4475_v36 = vcombine.low %v2035_v55, %v2043_v19  ;;  %v5110_v30 = vld [vmem:[%s5531_s17 + $0x18] sm:$0xff]   ;;  %v5121_v55 = vld [vmem:[%s5531_s17 + $0xf0] sm:$0xff]  }
 0x640   : > { %v1998_v41 = vmul.f32 %v1996_v22, %v1996_v22  ;;  %v5111_v58 = vld [vmem:[%s5531_s17 + $0x98] sm:$0xff]   ;;  %v5122_v19 = vld [vmem:[%s5531_s17 + $0x30] sm:$0xff]  }
 0x641   : > { %v1997_v34 = vmul.f32 %v1995_v45, %v1995_v45  ;;  %v2307_v21 = vsel %vm2293_vm7, %v4485_v26, 0  ;;  %v5117_v26 = vld [vmem:[%s5531_s17 + $0xe8] sm:$0xff]  }
 0x642   : > { %v2002_v33 = vsel %vm788_vm2, %v1998_v41, 0.0  ;;  %v4489_v41 = vcombine.low %v2050_v46, %v2058_v25 }
 0x643   : > { %2003 = vadd.xlane.f32.xlu1 %v2002_v33  ;;  %v1999_v51 = vsel %vm788_vm2, %v1997_v34, 0.0  ;;  %v4491_v34 = vcombine.low %v2051_v17, %v2059_v57  ;;  %v2036_v33 = vld [vmem:[%s5519_s3 + $0x30] sm:$0xff] }
 0x644   : > { %2000 = vadd.xlane.f32.xlu0 %v1999_v51  ;;  %v2044_v51 = vld [vmem:[%s5519_s3 + $0x70] sm:$0xff]  ;;  %v2319_v32 = vsel %vm2293_vm7, %v4489_v41, 0 }
 0x645   : > { %v2325_v52 = vsel %vm2293_vm7, %v4491_v34, 0  ;;  %v4478_v13 = vcombine.high %v2036_v33, %v2044_v51  ;;  %v4477_v28 = vcombine.low %v2036_v33, %v2044_v51  ;;  %v2062_v33 = vld [vmem:[%s5525_s22] sm:$0xff] }
 0x6d0   : > { %v2004_v44 = vpop.xlane.xlu1 %2003 }
 0x6d1   : > { %v2006_v56 = vmul.f32 0.035714287, %v2004_v44  ;;  %v2001_v42 = vpop.xlane.xlu0 %2000 }
 0x6d2   : > { %v2005_v16 = vmul.f32 0.035714287, %v2001_v42  ;;  %v5097_v42 = vld [vmem:[%s5531_s17 + $0xc0] sm:$0xff]  }
 0x6d3   : > { %v2008_v10 = vadd.f32 1e-05, %v2006_v56  ;;  %v5096_v56 = vld [vmem:[%s5531_s17 + $0x40] sm:$0xff]  }
 0x6d4   : > { %v2007_v49 = vadd.f32 1e-05, %v2005_v16  ;;  %v5098_v16 = vld [vmem:[%s5531_s17] sm:$0xff]  }
 0x6d5   : > { %5336 = vrsqrt.f32 %v2008_v10  ;;  %v5099_v10 = vld [vmem:[%s5531_s17 + $0x80] sm:$0xff]  }
 0x6d6   : > { %5338 = vrsqrt.f32 %v2007_v49  ;;  %v5100_v49 = vld [vmem:[%s5531_s17 + $0x48] sm:$0xff]  }
 0x6df   : > { %v5337_v18 = vpop.eup %5336 }
 0x6e0   : > { %v5339_v48 = vpop.eup %5338  ;;  %v2012_v14 = vmul.f32 %v5337_v18, %v1996_v22  ;;  %v4490_v22 = vcombine.high %v2050_v46, %v2058_v25  ;;  %v5101_v18 = vld [vmem:[%s5531_s17 + $0xc8] sm:$0xff]   ;;  %v5127_v46 = vld [vmem:[%s5531_s17 + $0xb8] sm:$0xff]   ;;  %v5128_v25 = vld [vmem:[%s5531_s17 + $0x140] sm:$0xff]  }
 0x6e1   : > { %v2011_v53 = vmul.f32 %v5339_v48, %v1995_v45  ;;  %v4492_v45 = vcombine.high %v2051_v17, %v2059_v57  ;;  %v5104_v48 = vld [vmem:[%s5531_s17 + $0x50] sm:$0xff]   ;;  %v5129_v17 = vld [vmem:[%s5531_s17 + $0x1c0] sm:$0xff]   ;;  %v2066_v57 = vlaneseq }
 0x6e2   : > { %v2020_v27 = vmul.f32 %v4463_v50, %v2012_v14  ;;  %v5105_v14 = vld [vmem:[%s5531_s17 + $0xd0] sm:$0xff]  }
 0x6e3   : > { %v2019_v3 = vmul.f32 %v4463_v50, %v2011_v53  ;;  %v5103_v50 = vld [vmem:[%s5531_s17 + $0x88] sm:$0xff]   ;;  %v5107_v53 = vld [vmem:[%s5531_s17 + $0x90] sm:$0xff]  }
 0x6e4   : > { %v6272_v29 = vadd.f32 %v4464_v24, %v2020_v27  ;;  %v5108_v27 = vld [vmem:[%s5531_s17 + $0x58] sm:$0xff]  }
 0x6e5   : > { %v6276_v39 = vadd.f32 %v4464_v24, %v2019_v3  ;;  %v5106_v24 = vld [vmem:[%s5531_s17 + $0x10] sm:$0xff]   ;;  %v5109_v3 = vld [vmem:[%s5531_s17 + $0xd8] sm:$0xff]  }
 0x6e7   : > { %v6280_v63 = vpack.c.bf16 %v6272_v29, %v6276_v39 }
 0x6e9   : > { %4498 = vmatmul.mubr.msk.bf16.vlgmr.msra.gmra.mrb[32].mxu0 %vm788_vm2, %v6280_v63  ;;  %4500 = vmatmul.mubr.msk.bf16.vlgmr.msra.gmra.mrb[32].mxu1 %vm788_vm2, %v6280_v63 }
 0x6ea   : > { %2429 = vmatpush1.bf16.msra.mxu0 %v4469_v62  ;;  %2472 = vmatpush1.bf16.msra.mxu1 %v4471_v4  ;;  %v4494_v62 = vcombine.high %v2052_v1, %v2060_v11  ;;  %v4495_v4 = vcombine.low %v2053_v60, %v2061_v0 }
 0x6eb   : > { %4501 = vmatprep.subr.msk.bf16.mxu0 %vm2293_vm7, %v4486_v2  ;;  %4503 = vmatprep.subr.msk.bf16.mxu1 %vm2293_vm7, %v4488_v31  ;;  %v5114_v2 = vld [vmem:[%s5531_s17 + $0x20] sm:$0xff]   ;;  %v5116_v31 = vld [vmem:[%s5531_s17 + $0x68] sm:$0xff]  }
 0x6ec   : > { %2460 = vmatprep.mubr.bf16.mxu0 %v5385_v38  ;;  %2503 = vmatprep.mubr.bf16.mxu1 %v5385_v38  ;;  %v2337_v44 = vsel %vm2293_vm7, %v4495_v4, 0 }
 0x6ee   : > { %2431 = vmatpush1.bf16.msra.mxu0 %v2307_v21  ;;  %2474 = vmatpush1.bf16.msra.mxu1 %v2313_v7  ;;  %v5123_v21 = vld [vmem:[%s5531_s17 + $0xb0] sm:$0xff]   ;;  %v5124_v7 = vld [vmem:[%s5531_s17 + $0x78] sm:$0xff]  }
 0x6ef   : > { %2514 = vmatprep.subr.bf16.mxu0 %v4474_v5  ;;  %2557 = vmatprep.subr.bf16.mxu1 %v4476_v61  ;;  %v5125_v5 = vld [vmem:[%s5531_s17 + $0xf8] sm:$0xff]  }
 0x6f0   : > { %v5126_v61 = vld [vmem:[%s5531_s17 + $0x38] sm:$0xff]  }
 0x6f1   : > { %4502 = vmatmul.mubr.msk.bf16.vlgmr.msra.gmra.mrb[36].mxu0 %vm788_vm2, %v6280_v63  ;;  %4504 = vmatmul.mubr.msk.bf16.vlgmr.msra.gmra.mrb[36].mxu1 %vm788_vm2, %v6280_v63 }
 0x6f2   : > { %2515 = vmatpush1.bf16.msra.mxu0 %v4473_v20  ;;  %2558 = vmatpush1.bf16.msra.mxu1 %v4475_v36  ;;  %v6366_v20 = vshrl.u32 %v2066_v57, 7 }
 0x6f3   : > { %4505 = vmatprep.subr.msk.bf16.mxu0 %vm2293_vm7, %v4490_v22  ;;  %4507 = vmatprep.subr.msk.bf16.mxu1 %vm2293_vm7, %v4492_v45  ;;  %v6370_v22 = vld [vmem:[%s5525_s22 + $0x8] sm:$0xff]  ;;  %s6641_s22 = sld [smem:[#allocation12_spill]] (!%p4644_p5) }
 0x6f4   : > { %2546 = vmatprep.mubr.bf16.mxu0 %v5385_v38  ;;  %2589 = vmatprep.mubr.bf16.mxu1 %v5385_v38  ;;  %v2092_v36 = vsub.s32 6, %v6366_v20  ;;  %v2068_v41 = vsub.s32 0, %v6366_v20  ;;  %v2076_v34 = vsub.s32 2, %v6366_v20  ;;  %v2072_v51 = vsub.s32 1, %v6366_v20 }
 0x6f5   : > { %v2080_v54 = vsub.s32 3, %v6366_v20  ;;  %v2088_v60 = vsub.s32 5, %v6366_v20  ;;  %v2096_v0 = vsub.s32 7, %v6366_v20 }
 0x6f6   : > { %2517 = vmatpush1.bf16.msra.mxu0 %v2319_v32  ;;  %2560 = vmatpush1.bf16.msra.mxu1 %v2325_v52  ;;  %v6373_v45 = vrot.slane %v6370_v22, %v2092_v36  ;;  %v2069_v59 = vrot.slane %v2062_v33, %v2068_v41  ;;  %v2077_v32 = vrot.slane %v2062_v33, %v2076_v34 }
 0x6f7   : > { %2600 = vmatprep.subr.bf16.mxu0 %v4478_v13  ;;  %2643 = vmatprep.subr.bf16.mxu1 %v4480_v12  ;;  %v2073_v52 = vrot.slane %v2062_v33, %v2072_v51  ;;  %v2081_v13 = vrot.slane %v2062_v33, %v2080_v54  ;;  %v2084_v12 = vsub.s32 4, %v6366_v20 }
 0x6f9   : > { %4506 = vmatmul.mubr.msk.bf16.vlgmr.msra.gmra.mrb[40].mxu0 %vm788_vm2, %v6280_v63  ;;  %4508 = vmatmul.mubr.msk.bf16.vlgmr.msra.gmra.mrb[40].mxu1 %vm788_vm2, %v6280_v63 }
 0x6fa   : > { %2601 = vmatpush1.bf16.msra.mxu0 %v4477_v28  ;;  %2644 = vmatpush1.bf16.msra.mxu1 %v4479_v6 }
 0x6fb   : > { %4509 = vmatprep.subr.msk.bf16.mxu0 %vm2293_vm7, %v4494_v62  ;;  %4511 = vmatprep.subr.msk.bf16.mxu1 %vm2293_vm7, %v4496_v8 }
 0x6fc   : > { %2632 = vmatprep.mubr.bf16.mxu0 %v5385_v38  ;;  %2675 = vmatprep.mubr.bf16.mxu1 %v5385_v38  ;;  %v5102_v38 = vld [vmem:[%s5531_s17 + $0x8] sm:$0xff]  }
 0x6fe   : > { %2603 = vmatpush1.bf16.msra.mxu0 %v2331_v15  ;;  %2646 = vmatpush1.bf16.msra.mxu1 %v2337_v44 }
 0x6ff   : > { %4727 = vmatprep.subr.bf16.mxu0 %v5096_v56  ;;  %4749 = vmatprep.subr.bf16.mxu1 %v5097_v42 }
 0x701   : > { %4510 = vmatmul.mubr.msk.bf16.vlgmr.msra.gmra.mrb[44].mxu0 %vm788_vm2, %v6280_v63  ;;  %4512 = vmatmul.mubr.msk.bf16.vlgmr.msra.gmra.mrb[44].mxu1 %vm788_vm2, %v6280_v63  ;;  %v5115_v63 = vld [vmem:[%s5531_s17 + $0xa0] sm:$0xff]  }
 0x702   : > { %4728 = vmatpush3.bf16.msra.mxu0 %v5098_v16  ;;  %4750 = vmatpush3.bf16.msra.mxu1 %v5099_v10 }
 0x703   : > { %4729 = vmatprep.subr.bf16.mxu0 %v5100_v49  ;;  %4751 = vmatprep.subr.bf16.mxu1 %v5101_v18  ;;  %v2085_v49 = vrot.slane %v2062_v33, %v2084_v12  ;;  %v2093_v18 = vrot.slane %v2062_v33, %v2092_v36 }
 0x706   : > { %4730 = vmatpush3.bf16.msra.mxu0 %v5102_v38  ;;  %4752 = vmatpush3.bf16.msra.mxu1 %v5103_v50 }
 0x707   : > { %4731 = vmatprep.subr.bf16.mxu0 %v5104_v48  ;;  %4753 = vmatprep.subr.bf16.mxu1 %v5105_v14  ;;  %v2089_v48 = vrot.slane %v2062_v33, %v2088_v60  ;;  %v2097_v14 = vrot.slane %v2062_v33, %v2096_v0 }
 0x70a   : > { %4732 = vmatpush3.bf16.msra.mxu0 %v5106_v24  ;;  %4754 = vmatpush3.bf16.msra.mxu1 %v5107_v53 }
 0x70b   : > { %4733 = vmatprep.subr.bf16.mxu0 %v5108_v27  ;;  %4755 = vmatprep.subr.bf16.mxu1 %v5109_v3 }
 0x70e   : > { %4734 = vmatpush3.bf16.msra.mxu0 %v5110_v30  ;;  %4756 = vmatpush3.bf16.msra.mxu1 %v5111_v58 }
 0x70f   : > { %4735 = vmatprep.subr.bf16.mxu0 %v5112_v35  ;;  %4757 = vmatprep.subr.bf16.mxu1 %v5113_v23 }
 0x712   : > { %4736 = vmatpush3.bf16.msra.mxu0 %v5114_v2  ;;  %4758 = vmatpush3.bf16.msra.mxu1 %v5115_v63 }
 0x713   : > { %4737 = vmatprep.subr.bf16.mxu0 %v5116_v31  ;;  %4759 = vmatprep.subr.bf16.mxu1 %v5117_v26 }
 0x716   : > { %4738 = vmatpush3.bf16.msra.mxu0 %v5118_v47  ;;  %4760 = vmatpush3.bf16.msra.mxu1 %v5119_v37 }
 0x717   : > { %4739 = vmatprep.subr.bf16.mxu0 %v5120_v40  ;;  %4761 = vmatprep.subr.bf16.mxu1 %v5121_v55  ;;  %v5130_v40 = vld [vmem:[%s5531_s17 + $0x100] sm:$0xff]  }
 0x718   : > { %v5131_v55 = vld [vmem:[%s5531_s17 + $0x180] sm:$0xff]  }
 0x71a   : > { %4740 = vmatpush3.bf16.msra.mxu0 %v5122_v19  ;;  %4762 = vmatpush3.bf16.msra.mxu1 %v5123_v21 }
 0x71b   : > { %4741 = vmatprep.subr.bf16.mxu0 %v5124_v7  ;;  %4763 = vmatprep.subr.bf16.mxu1 %v5125_v5 }
 0x71e   : > { %4742 = vmatpush3.bf16.msra.mxu0 %v5126_v61  ;;  %4764 = vmatpush3.bf16.msra.mxu1 %v5127_v46  ;;  %v5132_v61 = vld [vmem:[%s5531_s17 + $0x148] sm:$0xff]  }
 0x71f   : > { %4771 = vmatprep.subr.bf16.mxu0 %v5128_v25  ;;  %4793 = vmatprep.subr.bf16.mxu1 %v5129_v17  ;;  %v5133_v46 = vld [vmem:[%s5531_s17 + $0x1c8] sm:$0xff]   ;;  %v2101_v25 = vrot.slane %v6370_v22, %v2068_v41  ;;  %v2105_v41 = vrot.slane %v6370_v22, %v2072_v51  ;;  %v5137_v51 = vld [vmem:[%s5531_s17 + $0x1d0] sm:$0xff]  }
 0x7bc   : > { %v2376_v1 = vpop.f32.mrb[32].mxu0  ;;  %v2419_v11 = vpop.f32.mrb[32].mxu1 }
 0x7bd   : > { %v2377_v28 = vadd.f32 %v2376_v1, %v2069_v59  ;;  %v2420_v6 = vadd.f32 %v2419_v11, %v2077_v32  ;;  %v2378_v62 = vpop.f32.mrb[33].mxu0  ;;  %v2421_v8 = vpop.f32.mrb[33].mxu1 }
 0x7be   : > { %v2379_v43 = vadd.f32 %v2378_v62, %v2073_v52  ;;  %v2422_v4 = vadd.f32 %v2421_v8, %v2081_v13  ;;  %v2380_v15 = vpop.f32.mrb[34].mxu0  ;;  %v2423_v44 = vpop.f32.mrb[34].mxu1  ;;  %v5135_v62 = vld [vmem:[%s5531_s17 + $0x188] sm:$0xff]  }
 0x7bf   : > { %v2381_v56 = vadd.f32 %v2380_v15, %v2069_v59  ;;  %v2424_v42 = vadd.f32 %v2423_v44, %v2077_v32  ;;  %v2382_v16 = vpop.f32.mrb[35].mxu0  ;;  %v2425_v10 = vpop.f32.mrb[35].mxu1  ;;  %v2686_v24 = vmax.f32 %v2377_v28, 0.0  ;;  %v2688_v53 = vmax.f32 %v2420_v6, 0.0  ;;  %v5134_v6 = vld [vmem:[%s5531_s17 + $0x108] sm:$0xff]   ;;  %v5136_v44 = vld [vmem:[%s5531_s17 + $0x150] sm:$0xff]  }
 0x7c0   : > { %v2383_v38 = vadd.f32 %v2382_v16, %v2073_v52  ;;  %v2426_v50 = vadd.f32 %v2425_v10, %v2081_v13  ;;  %v2687_v30 = vmax.f32 %v2379_v43, 0.0  ;;  %v2689_v58 = vmax.f32 %v2422_v4, 0.0 }
 0x7c1   : > { %v2702_v27 = vmax.f32 %v2381_v56, 0.0  ;;  %v2704_v3 = vmax.f32 %v2424_v42, 0.0  ;;  %v2109_v59 = vrot.slane %v6370_v22, %v2076_v34  ;;  %v2113_v34 = vrot.slane %v6370_v22, %v2080_v54 }
 0x7c2   : > { %v2703_v35 = vmax.f32 %v2383_v38, 0.0  ;;  %v2705_v23 = vmax.f32 %v2426_v50, 0.0 }
 0x7c3   : > { %v2718_v2 = vpack.c.bf16 %v2702_v27, %v2686_v24  ;;  %v2720_v63 = vpack.c.bf16 %v2704_v3, %v2688_v53  ;;  %v5139_v24 = vld [vmem:[%s5531_s17 + $0x190] sm:$0xff]  }
 0x7c4   : > { %v2719_v31 = vpack.c.bf16 %v2703_v35, %v2687_v30  ;;  %v2721_v26 = vpack.c.bf16 %v2705_v23, %v2689_v58  ;;  %v2462_v47 = vpop.f32.mrb[36].mxu0  ;;  %v2505_v37 = vpop.f32.mrb[36].mxu1  ;;  %v5140_v58 = vld [vmem:[%s5531_s17 + $0x158] sm:$0xff]  }
 0x7c5   : > { %v2463_v19 = vadd.f32 %v2462_v47, %v2085_v49  ;;  %v2506_v21 = vadd.f32 %v2505_v37, %v2093_v18  ;;  %v2464_v7 = vpop.f32.mrb[37].mxu0  ;;  %v2507_v5 = vpop.f32.mrb[37].mxu1  ;;  %v5141_v35 = vld [vmem:[%s5531_s17 + $0x1d8] sm:$0xff]  }
 0x7c6   : > { %v2465_v17 = vadd.f32 %v2464_v7, %v2089_v48  ;;  %v2508_v57 = vadd.f32 %v2507_v5, %v2097_v14  ;;  %v2466_v36 = vpop.f32.mrb[38].mxu0  ;;  %v2509_v33 = vpop.f32.mrb[38].mxu1  ;;  %3797 = vmatprep.mubr.bf16.mxu0 %v2719_v31  ;;  %3838 = vmatprep.mubr.bf16.mxu1 %v2721_v26  ;;  %v5142_v5 = vld [vmem:[%s5531_s17 + $0x118] sm:$0xff]  }
 0x7c7   : > { %v2467_v32 = vadd.f32 %v2466_v36, %v2085_v49  ;;  %v2510_v52 = vadd.f32 %v2509_v33, %v2093_v18  ;;  %v2468_v13 = vpop.f32.mrb[39].mxu0  ;;  %v2511_v1 = vpop.f32.mrb[39].mxu1  ;;  %3798 = vmatmul.mubr.bf16.vlgmr.msra.gmra.mrb[48].mxu0 %v2718_v2  ;;  %3839 = vmatmul.mubr.bf16.vlgmr.msra.gmra.mrb[48].mxu1 %v2720_v63  ;;  %v2690_v8 = vmax.f32 %v2463_v19, 0.0  ;;  %v2692_v43 = vmax.f32 %v2506_v21, 0.0 }
 0x7c8   : > { %v2469_v11 = vadd.f32 %v2468_v13, %v2089_v48  ;;  %v2512_v28 = vadd.f32 %v2511_v1, %v2097_v14  ;;  %4772 = vmatpush3.bf16.msra.mxu0 %v5130_v40  ;;  %4794 = vmatpush3.bf16.msra.mxu1 %v5131_v55  ;;  %v2691_v56 = vmax.f32 %v2465_v17, 0.0  ;;  %v2693_v42 = vmax.f32 %v2508_v57, 0.0  ;;  %v5138_v14 = vld [vmem:[%s5531_s17 + $0x110] sm:$0xff]  }
 0x7c9   : > { %v2706_v4 = vmax.f32 %v2467_v32, 0.0  ;;  %v2708_v15 = vmax.f32 %v2510_v52, 0.0  ;;  %4773 = vmatprep.subr.bf16.mxu0 %v5132_v61  ;;  %4795 = vmatprep.subr.bf16.mxu1 %v5133_v46  ;;  %v2117_v55 = vrot.slane %v6370_v22, %v2084_v12  ;;  %v2121_v19 = vrot.slane %v6370_v22, %v2088_v60  ;;  %v5143_v61 = vld [vmem:[%s5531_s17 + $0x198] sm:$0xff]   ;;  %v5144_v12 = vld [vmem:[%s5531_s17 + $0x160] sm:$0xff]  }
 0x7ca   : > { %v2707_v16 = vmax.f32 %v2469_v11, 0.0  ;;  %v2709_v10 = vmax.f32 %v2512_v28, 0.0  ;;  %v2129_v46 = vrot.slane %v6370_v22, %v2096_v0  ;;  %v5145_v60 = vld [vmem:[%s5531_s17 + $0x1e0] sm:$0xff]  }
 0x7cb   : > { %v6409_v49 = vpack.c.bf16 %v2706_v4, %v2690_v8  ;;  %v6411_v18 = vpack.c.bf16 %v2708_v15, %v2692_v43  ;;  %v5146_v11 = vld [vmem:[%s5531_s17 + $0x120] sm:$0xff]   ;;  %v5148_v43 = vld [vmem:[%s5531_s17 + $0x168] sm:$0xff]  }
 0x7cc   : > { %v2723_v54 = vpack.c.bf16 %v2707_v16, %v2691_v56  ;;  %v2725_v38 = vpack.c.bf16 %v2709_v10, %v2693_v42  ;;  %4774 = vmatpush3.bf16.msra.mxu0 %v5134_v6  ;;  %4796 = vmatpush3.bf16.msra.mxu1 %v5135_v62  ;;  %v2548_v50 = vpop.f32.mrb[40].mxu0  ;;  %v2591_v48 = vpop.f32.mrb[40].mxu1  ;;  %v5147_v28 = vld [vmem:[%s5531_s17 + $0x1a0] sm:$0xff]   ;;  %v5149_v4 = vld [vmem:[%s5531_s17 + $0x1e8] sm:$0xff]  }
 0x7cd   : > { %v2549_v53 = vadd.f32 %v2548_v50, %v2101_v25  ;;  %v2592_v27 = vadd.f32 %v2591_v48, %v2109_v59  ;;  %v2550_v3 = vpop.f32.mrb[41].mxu0  ;;  %v2593_v30 = vpop.f32.mrb[41].mxu1  ;;  %4775 = vmatprep.subr.bf16.mxu0 %v5136_v44  ;;  %4797 = vmatprep.subr.bf16.mxu1 %v5137_v51  ;;  %v5150_v48 = vld [vmem:[%s5531_s17 + $0x128] sm:$0xff]  }
 0x7ce   : > { %v2551_v23 = vadd.f32 %v2550_v3, %v2105_v41  ;;  %v2594_v2 = vadd.f32 %v2593_v30, %v2113_v34  ;;  %v2552_v63 = vpop.f32.mrb[42].mxu0  ;;  %v2595_v31 = vpop.f32.mrb[42].mxu1  ;;  %3879 = vmatprep.mubr.bf16.mxu0 %v2723_v54  ;;  %3920 = vmatprep.mubr.bf16.mxu1 %v2725_v38  ;;  %v5152_v30 = vld [vmem:[%s5531_s17 + $0x170] sm:$0xff]  }
 0x7cf   : > { %v2553_v26 = vadd.f32 %v2552_v63, %v2101_v25  ;;  %v2596_v47 = vadd.f32 %v2595_v31, %v2109_v59  ;;  %v2554_v37 = vpop.f32.mrb[43].mxu0  ;;  %v2597_v40 = vpop.f32.mrb[43].mxu1  ;;  %v2694_v25 = vmax.f32 %v2549_v53, 0.0  ;;  %v2696_v17 = vmax.f32 %v2592_v27, 0.0 }
 0x7d0   : > { %v2555_v21 = vadd.f32 %v2554_v37, %v2105_v41  ;;  %v2598_v7 = vadd.f32 %v2597_v40, %v2113_v34  ;;  %4776 = vmatpush3.bf16.msra.mxu0 %v5138_v14  ;;  %4798 = vmatpush3.bf16.msra.mxu1 %v5139_v24  ;;  %v2695_v33 = vmax.f32 %v2551_v23, 0.0  ;;  %v2697_v59 = vmax.f32 %v2594_v2, 0.0  ;;  %v5151_v14 = vld [vmem:[%s5531_s17 + $0x1a8] sm:$0xff]   ;;  %v5154_v37 = vld [vmem:[%s5531_s17 + $0x130] sm:$0xff]  }
 0x7d1   : > { %v2710_v57 = vmax.f32 %v2553_v26, 0.0  ;;  %v2712_v36 = vmax.f32 %v2596_v47, 0.0  ;;  %4777 = vmatprep.subr.bf16.mxu0 %v5140_v58  ;;  %4799 = vmatprep.subr.bf16.mxu1 %v5141_v35  ;;  %v5155_v40 = vld [vmem:[%s5531_s17 + $0x1b0] sm:$0xff]  }
 0x7d2   : > { %v2711_v32 = vmax.f32 %v2555_v21, 0.0  ;;  %v2713_v52 = vmax.f32 %v2598_v7, 0.0  ;;  %v5158_v21 = vld [vmem:[%s5531_s17 + $0x138] sm:$0xff]  }
 0x7d3   : > { %v6430_v13 = vpack.c.bf16 %v2710_v57, %v2694_v25  ;;  %v6432_v20 = vpack.c.bf16 %v2712_v36, %v2696_v17  ;;  %v5159_v7 = vld [vmem:[%s5531_s17 + $0x1b8] sm:$0xff]   ;;  %v5163_v25 = vld [vmem:[%s5531_s17 + $0x280] sm:$0xff]   ;;  %v5164_v17 = vld [vmem:[%s5531_s17 + $0x248] sm:$0xff]  }
 0x7d4   : > { %v6434_v22 = vpack.c.bf16 %v2711_v32, %v2695_v33  ;;  %v6436_v0 = vpack.c.bf16 %v2713_v52, %v2697_v59  ;;  %4778 = vmatpush3.bf16.msra.mxu0 %v5142_v5  ;;  %4800 = vmatpush3.bf16.msra.mxu1 %v5143_v61  ;;  %v2634_v1 = vpop.f32.mrb[44].mxu0  ;;  %v2677_v41 = vpop.f32.mrb[44].mxu1  ;;  %v5160_v5 = vld [vmem:[%s5531_s17 + $0x240] sm:$0xff]   ;;  %v5165_v57 = vld [vmem:[%s5531_s17 + $0x2c8] sm:$0xff]   ;;  %v5171_v33 = vld [vmem:[%s5531_s17 + $0x290] sm:$0xff]  }
 0x7d5   : > { %v2635_v6 = vadd.f32 %v2634_v1, %v2117_v55  ;;  %v2678_v62 = vadd.f32 %v2677_v41, %v6373_v45  ;;  %v2636_v34 = vpop.f32.mrb[45].mxu0  ;;  %v2679_v8 = vpop.f32.mrb[45].mxu1  ;;  %4779 = vmatprep.subr.bf16.mxu0 %v5144_v12  ;;  %4801 = vmatprep.subr.bf16.mxu1 %v5145_v60  ;;  %v5161_v61 = vld [vmem:[%s5531_s17 + $0x2c0] sm:$0xff]   ;;  %v5166_v36 = vld [vmem:[%s5531_s17 + $0x208] sm:$0xff]   ;;  %v5168_v60 = vld [vmem:[%s5531_s17 + $0x250] sm:$0xff]  }
 0x7d6   : > { %v2637_v15 = vadd.f32 %v2636_v34, %v2121_v19  ;;  %v2680_v44 = vadd.f32 %v2679_v8, %v2129_v46  ;;  %v2638_v51 = vpop.f32.mrb[46].mxu0  ;;  %v2681_v56 = vpop.f32.mrb[46].mxu1  ;;  %v5167_v12 = vld [vmem:[%s5531_s17 + $0x288] sm:$0xff]   ;;  %v5172_v59 = vld [vmem:[%s5531_s17 + $0x258] sm:$0xff]   ;;  %v5177_v1 = vld [vmem:[%s5531_s17 + $0x2e0] sm:$0xff]  }
 0x7d7   : > { %v2639_v42 = vadd.f32 %v2638_v51, %v2117_v55  ;;  %v2682_v16 = vadd.f32 %v2681_v56, %v6373_v45  ;;  %v2640_v10 = vpop.f32.mrb[47].mxu0  ;;  %v2683_v54 = vpop.f32.mrb[47].mxu1  ;;  %v2698_v24 = vmax.f32 %v2635_v6, 0.0  ;;  %v2700_v53 = vmax.f32 %v2678_v62, 0.0  ;;  %v5153_v45 = vld [vmem:[%s5531_s17 + $0x1f0] sm:$0xff]   ;;  %v5156_v55 = vld [vmem:[%s5531_s17 + $0x178] sm:$0xff]  }
 0x7d8   : > { %v2641_v38 = vadd.f32 %v2640_v10, %v2121_v19  ;;  %v2684_v50 = vadd.f32 %v2683_v54, %v2129_v46  ;;  %4780 = vmatpush3.bf16.msra.mxu0 %v5146_v11  ;;  %4802 = vmatpush3.bf16.msra.mxu1 %v5147_v28  ;;  %v2699_v58 = vmax.f32 %v2637_v15, 0.0  ;;  %v2701_v35 = vmax.f32 %v2680_v44, 0.0  ;;  %v5157_v19 = vld [vmem:[%s5531_s17 + $0x1f8] sm:$0xff]   ;;  %v5162_v46 = vld [vmem:[%s5531_s17 + $0x200] sm:$0xff]   ;;  %v5180_v28 = vld [vmem:[%s5531_s17 + $0x268] sm:$0xff]  }
 0x7d9   : > { %v2714_v27 = vmax.f32 %v2639_v42, 0.0  ;;  %v2716_v3 = vmax.f32 %v2682_v16, 0.0  ;;  %4781 = vmatprep.subr.bf16.mxu0 %v5148_v43  ;;  %4803 = vmatprep.subr.bf16.mxu1 %v5149_v4  ;;  %v5173_v32 = vld [vmem:[%s5531_s17 + $0x2d8] sm:$0xff]   ;;  %v5178_v41 = vld [vmem:[%s5531_s17 + $0x220] sm:$0xff]   ;;  %v5181_v6 = vld [vmem:[%s5531_s17 + $0x2e8] sm:$0xff]  }
 0x7da   : > { %v2715_v23 = vmax.f32 %v2641_v38, 0.0  ;;  %v2717_v2 = vmax.f32 %v2684_v50, 0.0  ;;  %v5174_v52 = vld [vmem:[%s5531_s17 + $0x218] sm:$0xff]   ;;  %v5179_v11 = vld [vmem:[%s5531_s17 + $0x2a0] sm:$0xff]   ;;  %v5182_v62 = vld [vmem:[%s5531_s17 + $0x228] sm:$0xff]  }
 0x7db   : > { %v6448_v63 = vpack.c.bf16 %v2714_v27, %v2698_v24  ;;  %v6450_v31 = vpack.c.bf16 %v2716_v3, %v2700_v53  ;;  %v5183_v34 = vld [vmem:[%s5531_s17 + $0x2a8] sm:$0xff]   ;;  %v5184_v8 = vld [vmem:[%s5531_s17 + $0x270] sm:$0xff]   ;;  %v5188_v44 = vld [vmem:[%s5531_s17 + $0x278] sm:$0xff]  }
 0x7dc   : > { %v6452_v26 = vpack.c.bf16 %v2715_v23, %v2699_v58  ;;  %v6454_v47 = vpack.c.bf16 %v2717_v2, %v2701_v35  ;;  %4782 = vmatpush3.bf16.msra.mxu0 %v5150_v48  ;;  %4804 = vmatpush3.bf16.msra.mxu1 %v5151_v14  ;;  %v5185_v43 = vld [vmem:[%s5531_s17 + $0x2f0] sm:$0xff]   ;;  %v5189_v51 = vld [vmem:[%s5531_s17 + $0x2f8] sm:$0xff]   ;;  %v5192_v16 = vld [vmem:[%s5531_s17 + $0x340] sm:$0xff]  }
 0x7dd   : > { %4783 = vmatprep.subr.bf16.mxu0 %v5152_v30  ;;  %4805 = vmatprep.subr.bf16.mxu1 %v5153_v45  ;;  %v5186_v4 = vld [vmem:[%s5531_s17 + $0x230] sm:$0xff]   ;;  %v5190_v56 = vld [vmem:[%s5531_s17 + $0x238] sm:$0xff]   ;;  %v5193_v10 = vld [vmem:[%s5531_s17 + $0x3c0] sm:$0xff]  }
 0x7de   : > { %v5187_v15 = vld [vmem:[%s5531_s17 + $0x2b0] sm:$0xff]   ;;  %v5191_v42 = vld [vmem:[%s5531_s17 + $0x2b8] sm:$0xff]   ;;  %v5194_v54 = vld [vmem:[%s5531_s17 + $0x300] sm:$0xff]  }
 0x7df   : > { %v5195_v38 = vld [vmem:[%s5531_s17 + $0x380] sm:$0xff]   ;;  %v5196_v50 = vld [vmem:[%s5531_s17 + $0x348] sm:$0xff]   ;;  %v5200_v53 = vld [vmem:[%s5531_s17 + $0x350] sm:$0xff]  }
 0x7e0   : > { %4784 = vmatpush3.bf16.msra.mxu0 %v5154_v37  ;;  %4806 = vmatpush3.bf16.msra.mxu1 %v5155_v40  ;;  %v5197_v48 = vld [vmem:[%s5531_s17 + $0x3c8] sm:$0xff]   ;;  %v5203_v27 = vld [vmem:[%s5531_s17 + $0x390] sm:$0xff]   ;;  %v5204_v3 = vld [vmem:[%s5531_s17 + $0x358] sm:$0xff]  }
 0x7e1   : > { %4785 = vmatprep.subr.bf16.mxu0 %v5156_v55  ;;  %4807 = vmatprep.subr.bf16.mxu1 %v5157_v19  ;;  %v5198_v14 = vld [vmem:[%s5531_s17 + $0x308] sm:$0xff]   ;;  %v5205_v30 = vld [vmem:[%s5531_s17 + $0x3d8] sm:$0xff]   ;;  %v5208_v35 = vld [vmem:[%s5531_s17 + $0x360] sm:$0xff]  }
 0x7e2   : > { %v5199_v24 = vld [vmem:[%s5531_s17 + $0x388] sm:$0xff]   ;;  %v5206_v45 = vld [vmem:[%s5531_s17 + $0x318] sm:$0xff]   ;;  %v5209_v23 = vld [vmem:[%s5531_s17 + $0x3e0] sm:$0xff]  }
 0x7e3   : > { %v5207_v58 = vld [vmem:[%s5531_s17 + $0x398] sm:$0xff]   ;;  %v5210_v2 = vld [vmem:[%s5531_s17 + $0x320] sm:$0xff]   ;;  %v5213_v37 = vld [vmem:[%s5531_s17 + $0x3e8] sm:$0xff]  }
 0x7e4   : > { %4786 = vmatpush3.bf16.msra.mxu0 %v5158_v21  ;;  %4808 = vmatpush3.bf16.msra.mxu1 %v5159_v7  ;;  %v5214_v40 = vld [vmem:[%s5531_s17 + $0x328] sm:$0xff]   ;;  %v5216_v19 = vld [vmem:[%s5531_s17 + $0x370] sm:$0xff]  }
 0x7e5   : > { %4815 = vmatprep.subr.bf16.mxu0 %v5160_v5  ;;  %4837 = vmatprep.subr.bf16.mxu1 %v5161_v61  ;;  %v5215_v55 = vld [vmem:[%s5531_s17 + $0x3a8] sm:$0xff]   ;;  %v5217_v21 = vld [vmem:[%s5531_s17 + $0x3f0] sm:$0xff]   ;;  %v5220_v61 = vld [vmem:[%s5531_s17 + $0x378] sm:$0xff]  }
 0x7e6   : > { %v5218_v7 = vld [vmem:[%s5531_s17 + $0x330] sm:$0xff]  }
 0x7e7   : > { %3880 = vmatmul.mubr.bf16.vlgmr.msra.gmra.mrb[52].mxu0 %v6409_v49  ;;  %3921 = vmatmul.mubr.bf16.vlgmr.msra.gmra.mrb[52].mxu1 %v6411_v18  ;;  %v5169_v49 = vld [vmem:[%s5531_s17 + $0x2d0] sm:$0xff]  }
 0x7e8   : > { %4816 = vmatpush3.bf16.msra.mxu0 %v5162_v46  ;;  %3961 = vmatprep.mubr.bf16.mxu0 %v6434_v22  ;;  %v5170_v18 = vld [vmem:[%s5531_s17 + $0x210] sm:$0xff]   ;;  %v5175_v22 = vld [vmem:[%s5531_s17 + $0x298] sm:$0xff]  }
 0x7e9   : > { %4838 = vmatpush3.bf16.msra.mxu1 %v5163_v25  ;;  %4002 = vmatprep.mubr.bf16.mxu1 %v6436_v0  ;;  %v5176_v0 = vld [vmem:[%s5531_s17 + $0x260] sm:$0xff]   ;;  %v5219_v5 = vld [vmem:[%s5531_s17 + $0x3b0] sm:$0xff]   ;;  %v5221_v46 = vld [vmem:[%s5531_s17 + $0x3f8] sm:$0xff]  }
 0x7ea   : > { %4817 = vmatprep.subr.bf16.mxu0 %v5164_v17  ;;  %4839 = vmatprep.subr.bf16.mxu1 %v5165_v57  ;;  %v5222_v25 = vld [vmem:[%s5531_s17 + $0x338] sm:$0xff]  }
 0x7eb   : > { %v5223_v17 = vld [vmem:[%s5531_s17 + $0x3b8] sm:$0xff]  }
 0x7ec   : > { %4818 = vmatpush3.bf16.msra.mxu0 %v5166_v36 }
 0x7ed   : > { %4840 = vmatpush3.bf16.msra.mxu1 %v5167_v12  ;;  %4819 = vmatprep.subr.bf16.mxu0 %v5168_v60  ;;  %v4513_v12 = vld [vmem:[%s702_s29] ss:$0 sm:$0xff] }
 0x7ee   : > { %4841 = vmatprep.subr.bf16.mxu1 %v5169_v49 }
 0x7f0   : > { %4820 = vmatpush3.bf16.msra.mxu0 %v5170_v18 }
 0x7f1   : > { %4842 = vmatpush3.bf16.msra.mxu1 %v5171_v33  ;;  %4821 = vmatprep.subr.bf16.mxu0 %v5172_v59 }
 0x7f2   : > { %4843 = vmatprep.subr.bf16.mxu1 %v5173_v32 }
 0x7f4   : > { %4822 = vmatpush3.bf16.msra.mxu0 %v5174_v52 }
 0x7f5   : > { %4844 = vmatpush3.bf16.msra.mxu1 %v5175_v22  ;;  %4823 = vmatprep.subr.bf16.mxu0 %v5176_v0 }
 0x7f6   : > { %4845 = vmatprep.subr.bf16.mxu1 %v5177_v1 }
 0x7f8   : > { %4824 = vmatpush3.bf16.msra.mxu0 %v5178_v41 }
 0x7f9   : > { %4846 = vmatpush3.bf16.msra.mxu1 %v5179_v11  ;;  %4825 = vmatprep.subr.bf16.mxu0 %v5180_v28 }
 0x7fa   : > { %4847 = vmatprep.subr.bf16.mxu1 %v5181_v6 }
 0x7fc   : > { %4826 = vmatpush3.bf16.msra.mxu0 %v5182_v62 }
 0x7fd   : > { %4848 = vmatpush3.bf16.msra.mxu1 %v5183_v34  ;;  %4827 = vmatprep.subr.bf16.mxu0 %v5184_v8 }
 0x7fe   : > { %4849 = vmatprep.subr.bf16.mxu1 %v5185_v43 }
 0x800   : > { %4828 = vmatpush3.bf16.msra.mxu0 %v5186_v4 }
 0x801   : > { %4850 = vmatpush3.bf16.msra.mxu1 %v5187_v15  ;;  %4829 = vmatprep.subr.bf16.mxu0 %v5188_v44 }
 0x802   : > { %4851 = vmatprep.subr.bf16.mxu1 %v5189_v51 }
 0x804   : > { %4830 = vmatpush3.bf16.msra.mxu0 %v5190_v56 }
 0x805   : > { %4852 = vmatpush3.bf16.msra.mxu1 %v5191_v42  ;;  %4859 = vmatprep.subr.bf16.mxu0 %v5192_v16 }
 0x806   : > { %4881 = vmatprep.subr.bf16.mxu1 %v5193_v10 }
 0x807   : > { %3962 = vmatmul.mubr.bf16.vlgmr.msra.gmra.mrb[56].mxu0 %v6430_v13  ;;  %v5201_v13 = vld [vmem:[%s5531_s17 + $0x3d0] sm:$0xff]  }
 0x808   : > { %4003 = vmatmul.mubr.bf16.vlgmr.msra.gmra.mrb[56].mxu1 %v6432_v20  ;;  %4860 = vmatpush3.bf16.msra.mxu0 %v5194_v54  ;;  %v5202_v20 = vld [vmem:[%s5531_s17 + $0x310] sm:$0xff]  }
 0x809   : > { %4043 = vmatprep.mubr.bf16.mxu0 %v6452_v26  ;;  %4882 = vmatpush3.bf16.msra.mxu1 %v5195_v38  ;;  %v5211_v26 = vld [vmem:[%s5531_s17 + $0x3a0] sm:$0xff]  }
 0x80a   : > { %4084 = vmatprep.mubr.bf16.mxu1 %v6454_v47  ;;  %4861 = vmatprep.subr.bf16.mxu0 %v5196_v50  ;;  %v5212_v47 = vld [vmem:[%s5531_s17 + $0x368] sm:$0xff]  }
 0x80b   : > { %4883 = vmatprep.subr.bf16.mxu1 %v5197_v48 }
 0x80c   : > { %4862 = vmatpush3.bf16.msra.mxu0 %v5198_v14 }
 0x80d   : > { %4884 = vmatpush3.bf16.msra.mxu1 %v5199_v24  ;;  %4863 = vmatprep.subr.bf16.mxu0 %v5200_v53 }
 0x80e   : > { %4885 = vmatprep.subr.bf16.mxu1 %v5201_v13 }
 0x810   : > { %4864 = vmatpush3.bf16.msra.mxu0 %v5202_v20 }
 0x811   : > { %4886 = vmatpush3.bf16.msra.mxu1 %v5203_v27  ;;  %4865 = vmatprep.subr.bf16.mxu0 %v5204_v3 }
 0x812   : > { %4887 = vmatprep.subr.bf16.mxu1 %v5205_v30 }
 0x814   : > { %4866 = vmatpush3.bf16.msra.mxu0 %v5206_v45 }
 0x815   : > { %4888 = vmatpush3.bf16.msra.mxu1 %v5207_v58  ;;  %4867 = vmatprep.subr.bf16.mxu0 %v5208_v35 }
 0x816   : > { %4889 = vmatprep.subr.bf16.mxu1 %v5209_v23 }
 0x818   : > { %4868 = vmatpush3.bf16.msra.mxu0 %v5210_v2 }
 0x819   : > { %4890 = vmatpush3.bf16.msra.mxu1 %v5211_v26  ;;  %4869 = vmatprep.subr.bf16.mxu0 %v5212_v47 }
 0x81a   : > { %4891 = vmatprep.subr.bf16.mxu1 %v5213_v37 }
 0x81c   : > { %4870 = vmatpush3.bf16.msra.mxu0 %v5214_v40 }
 0x81d   : > { %4892 = vmatpush3.bf16.msra.mxu1 %v5215_v55  ;;  %4871 = vmatprep.subr.bf16.mxu0 %v5216_v19 }
 0x81e   : > { %4893 = vmatprep.subr.bf16.mxu1 %v5217_v21 }
 0x820   : > { %4872 = vmatpush3.bf16.msra.mxu0 %v5218_v7 }
 0x821   : > { %4894 = vmatpush3.bf16.msra.mxu1 %v5219_v5  ;;  %4873 = vmatprep.subr.bf16.mxu0 %v5220_v61 }
 0x822   : > { %4895 = vmatprep.subr.bf16.mxu1 %v5221_v46 }
 0x824   : > { %4874 = vmatpush3.bf16.msra.mxu0 %v5222_v25 }
 0x825   : > { %4896 = vmatpush3.bf16.msra.mxu1 %v5223_v17 }
 0x827   : > { %4044 = vmatmul.mubr.bf16.vlgmr.msra.gmra.mrb[60].mxu0 %v6448_v63 }
 0x828   : > { %4085 = vmatmul.mubr.bf16.vlgmr.msra.gmra.mrb[60].mxu1 %v6450_v31 }
 0x89a   : > { %v4743_v57 = vpop.f32.mrb[48].mxu0  ;;  %v4765_v36 = vpop.f32.mrb[48].mxu1 }
 0x89b   : > { %v4744_v60 = vpop.f32.mrb[49].mxu0  ;;  %v4766_v49 = vpop.f32.mrb[49].mxu1 }
 0x89c   : > { %v4745_v18 = vadd.f32 %v4744_v60, %v4743_v57  ;;  %v4767_v33 = vadd.f32 %v4766_v49, %v4765_v36  ;;  %v4746_v59 = vpop.f32.mrb[50].mxu0  ;;  %v4768_v32 = vpop.f32.mrb[50].mxu1 }
 0x89d   : > { %v4747_v52 = vpop.f32.mrb[51].mxu0  ;;  %v4769_v22 = vpop.f32.mrb[51].mxu1 }
 0x89e   : > { %v3800_v0 = vadd.f32 %v4745_v18, %v4513_v12  ;;  %v4748_v1 = vadd.f32 %v4747_v52, %v4746_v59  ;;  %v4770_v63 = vadd.f32 %v4769_v22, %v4768_v32 }
 0x8a0   : > { %v3841_v41 = vadd.f32 %v4767_v33, %v3800_v0  ;;  %v3803_v31 = vadd.f32 %v4748_v1, %v4513_v12 }
 0x8a2   : > { %v3844_v11 = vadd.f32 %v4770_v63, %v3803_v31 }
 0x8ba   : > { %v4787_v28 = vpop.f32.mrb[52].mxu0  ;;  %v4809_v6 = vpop.f32.mrb[52].mxu1 }
 0x8bb   : > { %v4788_v62 = vpop.f32.mrb[53].mxu0  ;;  %v4810_v34 = vpop.f32.mrb[53].mxu1 }
 0x8bc   : > { %v4789_v8 = vadd.f32 %v4788_v62, %v4787_v28  ;;  %v4811_v43 = vadd.f32 %v4810_v34, %v4809_v6  ;;  %v4790_v4 = vpop.f32.mrb[54].mxu0  ;;  %v4812_v15 = vpop.f32.mrb[54].mxu1 }
 0x8bd   : > { %v4791_v44 = vpop.f32.mrb[55].mxu0  ;;  %v4813_v51 = vpop.f32.mrb[55].mxu1 }
 0x8be   : > { %v3882_v56 = vadd.f32 %v4789_v8, %v3841_v41  ;;  %v4792_v42 = vadd.f32 %v4791_v44, %v4790_v4  ;;  %v4814_v16 = vadd.f32 %v4813_v51, %v4812_v15  ;;  %v4642_v4 = vld [vmem:[%s705_s0] ss:$0 sm:$0xff] }
 0x8bf   : > { %v4643_v51 = vld [vmem:[%s708_s1] ss:$0 sm:$0xff] }
 0x8c0   : > { %v3923_v10 = vadd.f32 %v4811_v43, %v3882_v56  ;;  %v3885_v54 = vadd.f32 %v4792_v42, %v3844_v11 }
 0x8c2   : > { %v3926_v38 = vadd.f32 %v4814_v16, %v3885_v54 }
 0x8da   : > { %v4831_v50 = vpop.f32.mrb[56].mxu0 }
 0x8db   : > { %v4853_v48 = vpop.f32.mrb[56].mxu1  ;;  %v4832_v14 = vpop.f32.mrb[57].mxu0 }
 0x8dc   : > { %v4833_v24 = vadd.f32 %v4832_v14, %v4831_v50  ;;  %v4854_v53 = vpop.f32.mrb[57].mxu1  ;;  %v4834_v13 = vpop.f32.mrb[58].mxu0  ;;  %v4146_v50 = vld [vmem:[%s6639_s2 + $0x8] sm:$0xff] (!%p4644_p5) }
 0x8dd   : > { %v4855_v20 = vadd.f32 %v4854_v53, %v4853_v48  ;;  %v4856_v27 = vpop.f32.mrb[58].mxu1  ;;  %v4835_v3 = vpop.f32.mrb[59].mxu0  ;;  %v4147_v48 = vld [vmem:[%s6639_s2 + $0x10] sm:$0xff] (!%p4644_p5) }
 0x8de   : > { %v3964_v30 = vadd.f32 %v4833_v24, %v3923_v10  ;;  %v4836_v45 = vadd.f32 %v4835_v3, %v4834_v13  ;;  %v4857_v58 = vpop.f32.mrb[59].mxu1  ;;  %v4148_v24 = vld [vmem:[%s6639_s2 + $0x18] sm:$0xf] (!%p4644_p5)  ;;  %v4645_v13 = vld [vmem:[%s6640_s23] ss:$0 sm:$0xff] (!%p4644_p5) }
 0x8df   : > { %v4858_v35 = vadd.f32 %v4857_v58, %v4856_v27  ;;  %v5068_v53 = vpack.c.bf16 (!%p4644_p5), %v4148_v24, %v4147_v48 }
 0x8e0   : > { %v4005_v23 = vadd.f32 %v4855_v20, %v3964_v30  ;;  %v3967_v2 = vadd.f32 %v4836_v45, %v3926_v38  ;;  %v4145_v38 = vld [vmem:[%s6639_s2] sm:$0xff] (!%p4644_p5) }
 0x8e1   : > { %v5064_v14 = vpack.c.bf16 (!%p4644_p5), %v4146_v50, %v4145_v38 }
 0x8e2   : > { %v4008_v26 = vadd.f32 %v4858_v35, %v3967_v2 }
 0x8e3   : > { %5065 = vmatprep.subr.bf16.mxu0 (!%p4644_p5), %v5064_v14 }
 0x8e4   : > { %5067 = vmatpush3.bf16.msra.mxu0 (!%p4644_p5), %v5064_v14 }
 0x8e5   : > { %5070 = vmatprep.subr.msk.bf16.mxu0 (!%p4644_p5), %vm5552_vm4, %v5068_v53 }
 0x8e8   : > { %5073 = vmatpush3.bf16.msk.msra.mxu0 (!%p4644_p5), %vm5552_vm4, %v5068_v53 }
 0x8fa   : > { %v4875_v47 = vpop.f32.mrb[60].mxu0 }
 0x8fb   : > { %v4897_v37 = vpop.f32.mrb[60].mxu1  ;;  %v4876_v40 = vpop.f32.mrb[61].mxu0 }
 0x8fc   : > { %v4877_v55 = vadd.f32 %v4876_v40, %v4875_v47  ;;  %v4898_v19 = vpop.f32.mrb[61].mxu1  ;;  %v4878_v21 = vpop.f32.mrb[62].mxu0 }
 0x8fd   : > { %v4899_v7 = vadd.f32 %v4898_v19, %v4897_v37  ;;  %v4900_v5 = vpop.f32.mrb[62].mxu1  ;;  %v4879_v61 = vpop.f32.mrb[63].mxu0 }
 0x8fe   : > { %v4046_v46 = vadd.f32 %v4877_v55, %v4005_v23  ;;  %v4880_v25 = vadd.f32 %v4879_v61, %v4878_v21  ;;  %v4901_v17 = vpop.f32.mrb[63].mxu1 }
 0x8ff   : > { %v4902_v57 = vadd.f32 %v4901_v17, %v4900_v5 }
 0x900   : > { %v4087_v36 = vadd.f32 %v4899_v7, %v4046_v46  ;;  %v4049_v12 = vadd.f32 %v4880_v25, %v4008_v26 }
 0x902   : > { %v4090_v60 = vadd.f32 %v4902_v57, %v4049_v12  ;;  %v4093_v49 = vadd.f32 %v4087_v36, %v6276_v39 }
 0x904   : > { %v4097_v18 = vsel %vm788_vm2, %v4093_v49, 0.0  ;;  %v4094_v33 = vadd.f32 %v4090_v60, %v6272_v29 }
 0x905   : > { %4098 = vadd.xlane.f32.xlu0 %v4097_v18 }
 0x906   : > { %v4100_v59 = vsel %vm788_vm2, %v4094_v33, 0.0 }
 0x907   : > { %4101 = vadd.xlane.f32.xlu1 %v4100_v59 }
 0x992   : > { %v4099_v32 = vpop.xlane.xlu0 %4098 }
 0x993   : > { %v4103_v52 = vmul.f32 0.035714287, %v4099_v32 }
 0x994   : > { %v4102_v22 = vpop.xlane.xlu1 %4101 }
 0x995   : > { %v4105_v0 = vsub.f32 %v4093_v49, %v4103_v52  ;;  %v4104_v1 = vmul.f32 0.035714287, %v4102_v22 }
 0x997   : > { %v4106_v63 = vsub.f32 %v4094_v33, %v4104_v1  ;;  %v4107_v41 = vmul.f32 %v4105_v0, %v4105_v0 }
 0x999   : > { %v4109_v31 = vsel %vm788_vm2, %v4107_v41, 0.0  ;;  %v4108_v11 = vmul.f32 %v4106_v63, %v4106_v63 }
 0x99a   : > { %4110 = vadd.xlane.f32.xlu0 %v4109_v31 }
 0x99b   : > { %v4112_v39 = vsel %vm788_vm2, %v4108_v11, 0.0 }
 0x99c   : > { %4113 = vadd.xlane.f32.xlu1 %v4112_v39 }
 0xa27   : > { %v4111_v29 = vpop.xlane.xlu0 %4110 }
 0xa28   : > { %v4115_v28 = vmul.f32 0.035714287, %v4111_v29 }
 0xa29   : > { %v4114_v6 = vpop.xlane.xlu1 %4113 }
 0xa2a   : > { %v4117_v62 = vadd.f32 1e-05, %v4115_v28  ;;  %v4116_v34 = vmul.f32 0.035714287, %v4114_v6 }
 0xa2c   : > { %5340 = vrsqrt.f32 %v4117_v62  ;;  %v4118_v8 = vadd.f32 1e-05, %v4116_v34 }
 0xa2e   : > { %5342 = vrsqrt.f32 %v4118_v8 }
 0xa36   : > { %v5341_v43 = vpop.eup %5340 }
 0xa37   : > { %v4121_v15 = vmul.f32 %v5341_v43, %v4105_v0 }
 0xa38   : > { %v5343_v44 = vpop.eup %5342 }
 0xa39   : > { %v4129_v56 = vmul.f32 %v4642_v4, %v4121_v15  ;;  %v4122_v42 = vmul.f32 %v5343_v44, %v4106_v63  ;;  %4144 = sbr.rel (%p4644_p5) target bundleno = 2841 (0xb19), region = 96 }
 0xa3b   : > { %v4137_v16 = vadd.f32 %v4643_v51, %v4129_v56  ;;  %v4130_v10 = vmul.f32 %v4642_v4, %v4122_v42 }
 0xa3d   : > { %4139 = vst.msk [vmem:[#allocation2] sm:$0xff] %vm788_vm2, %v4137_v16  ;;  %v4138_v54 = vadd.f32 %v4643_v51, %v4130_v10  ;;  %5031 = vmatprep.mubr.msk.f32.mxu0 (!%p4644_p5), %vm788_vm2, %v4137_v16 }
 0xa3f   : > { %4140 = vst.msk [vmem:[#allocation2 + $0x8] sm:$0xff] %vm788_vm2, %v4138_v54  ;;  %5032 = vmatmul.mubr.msk.f32.vlgmr.msra.gmra.mrb[0].mxu0 (!%p4644_p5), %vm788_vm2, %v4138_v54 }
 0xb12   : > { %v5033_v20 = vpop.f32.mrb[0].mxu0 }
 0xb13   : > { %v4237_v27 = vadd.f32 %v5033_v20, %v4645_v13  ;;  %v4231_v3 = vpop.f32.mrb[1].mxu0 }
 0xb14   : > { %v4232_v30 = vadd.f32 %v4645_v13, %v4231_v3 }
 0xb15   : > { %v4241_v45 = vmax.f32 %v4237_v27, 0.0 }
 0xb16   : > { %v4240_v58 = vmax.f32 %v4232_v30, 0.0 }
 0xb17   : > { %4243 = vst.msk [vmem:[%s6641_s22 + $0x8] sm:$0xff] %vm788_vm2, %v4241_v45 }
 0xb18   : > { %4242 = vst.msk [vmem:[%s6641_s22] sm:$0xff] %vm788_vm2, %v4240_v58 }
 0xb19 PF: > { %s6642_s9 = sld [smem:[#allocation3_spill]] }
 0xb1f   : > { %s27_s24 = sadd.s32 1, %s6642_s9  }
 0xb20   : > { %p24_p6 = scmp.ge.s32.totalorder %s27_s24, 8  }
 0xb22   :  { %26 = sbr.rel (!%p24_p6) target bundleno = 10 (0xa), region = 155 }

</bundles_post_ra>
